<compile_context>
chip_gen: v7x
topology: tpu7x:2x2x1
jax: 0.10.0
libtpu: 0.0.40
codegen_flags: <defaults>
</compile_context>

<pallas_src>
import functools

import jax
import jax.numpy as jnp
from jax import lax
from jax.experimental import pallas as pl
from jax.experimental.pallas import tpu as pltpu


_NEG_INF = -9000000000000000.0   # same masking constant as the PyTorch reference


def _elu(x):
    # exact ELU(alpha=1); clamp the unused branch so exp() cannot overflow pre-select
    return jnp.where(x > 0, x, jnp.exp(jnp.minimum(x, 0.0)) - 1.0)


def _gat2_kernel(h_ref, bias_ref, w1_ref, w2_ref, out_ref,
                 whb_ref, proj1_ref, hid_ref, wh2b_ref, proj2_ref, *,
                 alpha, nheads):
    """Both GAT stages for a tile of `tb` (batch*group) items.

    h_ref    : (tb, n, fin)                    bf16  node features
    bias_ref : (n, n)                          f32   additive adjacency mask (0 / -9e15)
    w1_ref   : (fin, fout1*H + 2*H)            bf16  [W_h... | W_h a1_h... | W_h a2_h...]
    w2_ref   : (fout1*H, fout2 + 2)            bf16  [W_out | W_out a1 | W_out a2]
    out_ref  : (tb, n, fout2)                  f32
    """
    tb, n, fin = h_ref.shape
    f1tot = whb_ref.shape[-1]
    fout1 = f1tot // nheads
    fout2 = out_ref.shape[-1]

    bias = bias_ref[...]                                           # (n, n)

    # ---- stage 1 / phase A: one full-tile MXU matmul (all heads + a1/a2 projections)
    h2d = h_ref[...].reshape(tb * n, fin)                          # bf16
    wh_aug = jnp.dot(h2d, w1_ref[...], preferred_element_type=jnp.float32)
    # cast Wh to bf16 ONCE (it is only a matmul operand below); projections stay f32
    whb_ref[...] = wh_aug[:, :f1tot].astype(jnp.bfloat16).reshape(tb, n, f1tot)
    proj1_ref[...] = wh_aug[:, f1tot:].reshape(tb, n, 2 * nheads)

    # ---- stage 1 / phase B: per-item attention for every head
    def layer1_item(b, carry):
        wh_b = whb_ref[b]                                          # (n, f1tot) bf16
        proj_b = proj1_ref[b]                                      # (n, 2H)    f32
        for hd in range(nheads):
            wh1 = proj_b[:, hd:hd + 1]                             # (n, 1) = Wh_h a1_h
            wh2 = proj_b[:, nheads + hd:nheads + hd + 1]           # (n, 1) = Wh_h a2_h
            e = wh1 + wh2.T                                        # (n, n)
            e = jnp.where(e > 0, e, alpha * e)                     # LeakyReLU(alpha)
            logits = e + bias                                      # mask non-edges
            m = jnp.max(logits, axis=-1, keepdims=True)
            p = jnp.exp(logits - m)
            s = jnp.sum(p, axis=-1, keepdims=True)
            att = p * pl.reciprocal(s, approx=True)
            hp = jnp.dot(att.astype(jnp.bfloat16),
                         wh_b[:, hd * fout1:(hd + 1) * fout1],
                         preferred_element_type=jnp.float32)       # (n, fout1)
            # concat=True head => per-head ELU; direct slice store (no concatenation)
            hid_ref[b, :, hd * fout1:(hd + 1) * fout1] = _elu(hp)
        return carry

    lax.fori_loop(0, tb, layer1_item, 0, unroll=True)

    # ---- stage 2 / phase C: out_att projection for the whole tile in one matmul
    hid2d = hid_ref[...].astype(jnp.bfloat16).reshape(tb * n, f1tot)
    wh2_aug = jnp.dot(hid2d, w2_ref[...], preferred_element_type=jnp.float32)
    wh2b_ref[...] = wh2_aug[:, :fout2].astype(jnp.bfloat16).reshape(tb, n, fout2)
    proj2_ref[...] = wh2_aug[:, fout2:].reshape(tb, n, 2)

    # ---- stage 2 / phase D: per-item out_att attention + final ELU (GAT.forward)
    def layer2_item(b, carry):
        wh_b = wh2b_ref[b]                                         # (n, fout2) bf16
        proj_b = proj2_ref[b]                                      # (n, 2)     f32
        e = proj_b[:, 0:1] + proj_b[:, 1:2].T
        e = jnp.where(e > 0, e, alpha * e)
        logits = e + bias
        m = jnp.max(logits, axis=-1, keepdims=True)
        p = jnp.exp(logits - m)
        s = jnp.sum(p, axis=-1, keepdims=True)
        att = p * pl.reciprocal(s, approx=True)
        hp = jnp.dot(att.astype(jnp.bfloat16), wh_b,
                     preferred_element_type=jnp.float32)           # (n, fout2)
        out_ref[b] = _elu(hp).astype(out_ref.dtype)
        return carry

    lax.fori_loop(0, tb, layer2_item, 0, unroll=True)


# ----------------------------- wrapper / sizing --------------------------------

def _tpu_config():
    """(VMEM budget bytes, TensorCores per chip) for the current backend."""
    kind = ""
    try:
        kind = jax.devices()[0].device_kind.lower()
    except Exception:
        pass
    if "v7" in kind or "7x" in kind:
        return 48 * 2**20, 2          # 64 MiB physical VMEM, 2 TCs per chip
    if "v4" in kind or "v5" in kind or "v6" in kind:
        return 96 * 2**20, 1          # 128 MiB physical VMEM, 1 TC
    return 12 * 2**20, 1              # unknown/older: stay under conservative default


def _pad2(r, c, itemsize):
    return ((r + 7) // 8) * 8 * ((c + 127) // 128) * 128 * itemsize


def _vmem_bytes(tb, n, fin, f1tot, fout2, nheads):
    """Conservative per-step VMEM estimate: double-buffered blocks + scratch + temps."""
    rows = tb * n
    dbl = 2 * (_pad2(rows, fin, 2)                    # h (bf16)
               + _pad2(n, n, 4)                       # adjacency bias
               + _pad2(fin, f1tot + 2 * nheads, 2)    # w1_aug (bf16)
               + _pad2(f1tot, fout2 + 2, 2)           # w2_aug (bf16)
               + _pad2(rows, fout2, 4))               # output
    scratch = (_pad2(rows, f1tot, 2)                  # whb (bf16)
               + _pad2(rows, 2 * nheads, 4)           # proj1
               + _pad2(rows, f1tot, 4)                # hidden
               + _pad2(rows, fout2, 2)                # wh2b (bf16)
               + _pad2(rows, 2, 4))                   # proj2
    temps = (_pad2(rows, f1tot + 2 * nheads, 4)       # wh_aug
             + _pad2(rows, fout2 + 2, 4)              # wh2_aug
             + 4 * _pad2(n, n, 4))                    # per-item softmax temporaries
    return dbl + scratch + temps


def _choose_tb(bg, n, fin, f1tot, fout2, nheads, vmem_budget, num_cores):
    """Largest per-step item tile that keeps >= 2 grid steps per TensorCore
    (4 on v7x, 2 elsewhere) and fits the VMEM budget.  Maximizing tb also
    maximizes the MXU M dimension (tb*n rows per projection matmul)."""
    min_steps = max(1, min(bg, 2 * num_cores))
    best = 1
    for tb in range(1, bg + 1):
        if bg % tb or bg // tb < min_steps:
            continue
        if _vmem_bytes(tb, n, fin, f1tot, fout2, nheads) <= int(0.7 * vmem_budget):
            best = tb
    return best


def gat_forward(x, adj, params, *, alpha, nheads, order=1, tb=None):
    """GAT.forward in eval mode (all dropouts are identity). x: [B, G, N, n_in]."""
    assert order == 1  # TODO(synk): order > 1 second-order attention branch not implemented
    B, G, N, Fin = x.shape
    n_out = params["W"][0].shape[1]
    f1tot = n_out * nheads
    bg = B * G

    # additive adjacency mask (same -9e15 constant as the PyTorch code), built once
    adj_bias = jnp.where(adj > 0, 0.0, _NEG_INF).astype(jnp.float32)

    # Fold the attention vectors into the weights (associativity):
    #   h @ [W_h | W_h a1_h | W_h a2_h]  ==  [Wh_h | Wh_h a1_h | Wh_h a2_h]
    w_all = jnp.concatenate(params["W"], axis=1)                               # (Fin, f1tot)
    wa1 = jnp.stack([params["W"][h] @ params["a"][h][:n_out, 0]
                     for h in range(nheads)], axis=1)                          # (Fin, H)
    wa2 = jnp.stack([params["W"][h] @ params["a"][h][n_out:, 0]
                     for h in range(nheads)], axis=1)                          # (Fin, H)
    w1_aug = jnp.concatenate([w_all, wa1, wa2], axis=1).astype(jnp.bfloat16)

    w_out = params["W_out"]                                                    # (f1tot, n_out)
    wa1o = w_out @ params["a_out"][:n_out, :]                                  # (f1tot, 1)
    wa2o = w_out @ params["a_out"][n_out:, :]                                  # (f1tot, 1)
    w2_aug = jnp.concatenate([w_out, wa1o, wa2o], axis=1).astype(jnp.bfloat16)

    # pre-cast node features once in the wrapper (halves streamed DMA bytes)
    h = x.reshape(bg, N, Fin).astype(jnp.bfloat16)

    vmem_budget, num_cores = _tpu_config()
    if tb is None:
        tb = _choose_tb(bg, N, Fin, f1tot, n_out, nheads, vmem_budget, num_cores)
    assert bg % tb == 0

    kernel = functools.partial(_gat2_kernel, alpha=alpha, nheads=nheads)

    out = pl.pallas_call(
        kernel,
        out_shape=jax.ShapeDtypeStruct((bg, N, n_out), jnp.float32),
        grid_spec=pltpu.PrefetchScalarGridSpec(
            num_scalar_prefetch=0,
            grid=(bg // tb,),
            in_specs=[
                pl.BlockSpec((tb, N, Fin), lambda b: (b, 0, 0)),                 # node features
                pl.BlockSpec((N, N), lambda b: (0, 0)),                          # additive adj bias
                pl.BlockSpec((Fin, f1tot + 2 * nheads), lambda b: (0, 0)),       # stacked W1 + a
                pl.BlockSpec((f1tot, n_out + 2), lambda b: (0, 0)),              # stacked W2 + a
            ],
            out_specs=pl.BlockSpec((tb, N, n_out), lambda b: (b, 0, 0)),
            scratch_shapes=[
                pltpu.VMEM((tb, N, f1tot), jnp.bfloat16),       # Wh, all heads (bf16 once)
                pltpu.VMEM((tb, N, 2 * nheads), jnp.float32),   # per-head a1/a2 projections
                pltpu.VMEM((tb, N, f1tot), jnp.float32),        # hidden (stage-1 output)
                pltpu.VMEM((tb, N, n_out), jnp.bfloat16),       # W_out-projected hidden
                pltpu.VMEM((tb, N, 2), jnp.float32),            # out_att a1/a2 projections
            ],
        ),
        compiler_params=pltpu.CompilerParams(
            dimension_semantics=("parallel",),
            vmem_limit_bytes=vmem_budget,
        ),
    )(h, adj_bias, w1_aug, w2_aug)

    return out.reshape(B, G, N, n_out)


# ----------------------------- params / reference ------------------------------

def xavier_uniform(key, shape, gain=1.414):
    fan_in, fan_out = shape[0], shape[1]
    bound = gain * jnp.sqrt(6.0 / (fan_in + fan_out))
    return jax.random.uniform(key, shape, jnp.float32, -bound, bound)


def init_gat_params(key, n_in, n_out, nheads, order=1):
    params = {"W": [], "a": []}
    for _ in range(nheads):
        key, k1, k2 = jax.random.split(key, 3)
        params["W"].append(xavier_uniform(k1, (n_in, n_out)))
        params["a"].append(xavier_uniform(k2, (2 * n_out, 1)))
    key, k1, k2 = jax.random.split(key, 3)
    params["W_out"] = xavier_uniform(k1, (n_out * nheads * order, n_out))
    params["a_out"] = xavier_uniform(k2, (2 * n_out, 1))
    return params


def _gat_reference(x, adj, params, *, alpha, nheads):
    """Pure-JAX f32 eval-mode reference of the PyTorch module."""
    B, G, N, Fin = x.shape
    n_out = params["W"][0].shape[1]
    h = x.reshape(B * G, N, Fin)

    def layer(h_in, W, a, concat):
        Wh = h_in @ W
        wh1 = Wh @ a[:W.shape[1], :]
        wh2 = Wh @ a[W.shape[1]:, :]
        e = wh1 + jnp.swapaxes(wh2, -1, -2)
        e = jnp.where(e > 0, e, alpha * e)
        att = jnp.where(adj > 0, e, _NEG_INF)
        att = jax.nn.softmax(att, axis=-1)
        hp = att @ Wh
        return jax.nn.elu(hp) if concat else hp

    heads = [layer(h, params["W"][i], params["a"][i], True) for i in range(nheads)]
    hidden = jnp.concatenate(heads, axis=-1)
    out = jax.nn.elu(layer(hidden, params["W_out"], params["a_out"], False))
    return out.reshape(B, G, N, n_out)


if __name__ == "__main__":
    key = jax.random.PRNGKey(0)

    # small, module-consistent shapes
    B, G, N = 2, 2, 16
    n_in, n_out, nheads = 8, 16, 2
    alpha = 0.2
    dropout = 0.5  # unused in eval mode

    key, kx, kadj, kp = jax.random.split(key, 4)
    x = jax.random.normal(kx, (B, G, N, n_in), jnp.float32)

    # random symmetric binary adjacency with self-loops, shape (N, N)
    adj_rand = jax.random.uniform(kadj, (N, N))
    adj = (adj_rand + adj_rand.T > 1.0).astype(jnp.float32)
    adj = jnp.maximum(adj, jnp.eye(N, dtype=jnp.float32))

    params = init_gat_params(kp, n_in, n_out, nheads)

    out = gat_forward(x, adj, params, alpha=alpha, nheads=nheads)
    jax.block_until_ready(out)

    assert out.shape == (B, G, N, n_out), out.shape
    assert bool(jnp.all(jnp.isfinite(out)))

    # loose parity check vs f32 reference (bf16 operands + approx reciprocal in kernel)
    ref = _gat_reference(x, adj, params, alpha=alpha, nheads=nheads)
    err = float(jnp.max(jnp.abs(out - ref)))
    assert err < 0.5, f"max abs error vs reference too large: {err}"

    print("KERNEL_OK")
</pallas_src>

<mosaic_0001>
module attributes {stable_mosaic.version = 11 : i64} {
  func.func @_gat2_kernel(%arg0: i32, %arg1: memref<2x16x8xbf16, #tpu.memory_space<vmem>>, %arg2: memref<16x16xf32, #tpu.memory_space<vmem>>, %arg3: memref<8x36xbf16, #tpu.memory_space<vmem>>, %arg4: memref<32x18xbf16, #tpu.memory_space<vmem>>, %arg5: memref<2x16x16xf32, #tpu.memory_space<vmem>>, %arg6: memref<2x16x32xbf16, #tpu.memory_space<vmem>>, %arg7: memref<2x16x4xf32, #tpu.memory_space<vmem>>, %arg8: memref<2x16x32xf32, #tpu.memory_space<vmem>>, %arg9: memref<2x16x16xbf16, #tpu.memory_space<vmem>>, %arg10: memref<2x16x2xf32, #tpu.memory_space<vmem>>) attributes {dimension_semantics = [#tpu.dimension_semantics<parallel>], iteration_bounds = array<i64: 2>, scalar_prefetch = 0 : i64, scratch_operands = 5 : i64, tpu.core_type = #tpu.core_type<tc>, window_params = [{transform_indices = @transform_0, window_bounds = array<i64: 2, 16, 8>}, {pipeline_mode = #tpu.pipeline_mode<synchronous>, transform_indices = @transform_1, window_bounds = array<i64: 16, 16>}, {pipeline_mode = #tpu.pipeline_mode<synchronous>, transform_indices = @transform_2, window_bounds = array<i64: 8, 36>}, {pipeline_mode = #tpu.pipeline_mode<synchronous>, transform_indices = @transform_3, window_bounds = array<i64: 32, 18>}, {transform_indices = @transform_4, window_bounds = array<i64: 2, 16, 16>}]} {
    %c0 = arith.constant 0 : index
    %c0_0 = arith.constant 0 : index
    %0 = vector.load %arg2[%c0, %c0_0] : memref<16x16xf32, #tpu.memory_space<vmem>>, vector<16x16xf32>
    %c0_1 = arith.constant 0 : index
    %c0_2 = arith.constant 0 : index
    %c0_3 = arith.constant 0 : index
    %1 = vector.load %arg1[%c0_1, %c0_2, %c0_3] : memref<2x16x8xbf16, #tpu.memory_space<vmem>>, vector<2x16x8xbf16>
    %2 = vector.shape_cast %1 : vector<2x16x8xbf16> to vector<32x8xbf16>
    %c0_4 = arith.constant 0 : index
    %c0_5 = arith.constant 0 : index
    %3 = vector.load %arg3[%c0_4, %c0_5] : memref<8x36xbf16, #tpu.memory_space<vmem>>, vector<8x36xbf16>
    %cst = arith.constant dense<0.000000e+00> : vector<32x36xf32>
    %4 = tpu.matmul %2, %3, %cst {dimension_numbers = #tpu.dot_dimension_numbers<[1], [0], [0], [1], [0, 0, 1, 1], [], []>} : vector<32x8xbf16>, vector<8x36xbf16>, vector<32x36xf32> -> vector<32x36xf32>
    %5 = vector.extract_strided_slice %4 {offsets = [0, 0], sizes = [32, 32], strides = [1, 1]} : vector<32x36xf32> to vector<32x32xf32>
    %6 = arith.truncf %5 : vector<32x32xf32> to vector<32x32xbf16>
    %7 = vector.shape_cast %6 : vector<32x32xbf16> to vector<2x16x32xbf16>
    %c0_6 = arith.constant 0 : index
    %c0_7 = arith.constant 0 : index
    %c0_8 = arith.constant 0 : index
    %8 = vector.load %arg6[%c0_6, %c0_7, %c0_8] : memref<2x16x32xbf16, #tpu.memory_space<vmem>>, vector<2x16x32xbf16>
    tpu.vector_store %arg6[%c0_6, %c0_7, %c0_8], %7 {strides = array<i32>} : memref<2x16x32xbf16, #tpu.memory_space<vmem>>, vector<2x16x32xbf16>,
    %9 = vector.extract_strided_slice %4 {offsets = [0, 32], sizes = [32, 4], strides = [1, 1]} : vector<32x36xf32> to vector<32x4xf32>
    %10 = vector.shape_cast %9 : vector<32x4xf32> to vector<2x16x4xf32>
    %c0_9 = arith.constant 0 : index
    %c0_10 = arith.constant 0 : index
    %c0_11 = arith.constant 0 : index
    %11 = vector.load %arg7[%c0_9, %c0_10, %c0_11] : memref<2x16x4xf32, #tpu.memory_space<vmem>>, vector<2x16x4xf32>
    tpu.vector_store %arg7[%c0_9, %c0_10, %c0_11], %10 {strides = array<i32>} : memref<2x16x4xf32, #tpu.memory_space<vmem>>, vector<2x16x4xf32>,
    %c0_i32 = arith.constant 0 : i32
    %12 = arith.index_cast %c0_i32 : i32 to index
    %c0_12 = arith.constant 0 : index
    %c0_13 = arith.constant 0 : index
    %13 = vector.load %arg6[%12, %c0_12, %c0_13] : memref<2x16x32xbf16, #tpu.memory_space<vmem>>, vector<1x16x32xbf16>
    %14 = vector.shape_cast %13 : vector<1x16x32xbf16> to vector<16x32xbf16>
    %15 = arith.index_cast %c0_i32 : i32 to index
    %c0_14 = arith.constant 0 : index
    %c0_15 = arith.constant 0 : index
    %16 = vector.load %arg7[%15, %c0_14, %c0_15] : memref<2x16x4xf32, #tpu.memory_space<vmem>>, vector<1x16x4xf32>
    %17 = vector.shape_cast %16 : vector<1x16x4xf32> to vector<16x4xf32>
    %18 = vector.extract_strided_slice %17 {offsets = [0, 0], sizes = [16, 1], strides = [1, 1]} : vector<16x4xf32> to vector<16x1xf32>
    %19 = vector.extract_strided_slice %17 {offsets = [0, 2], sizes = [16, 1], strides = [1, 1]} : vector<16x4xf32> to vector<16x1xf32>
    %20 = tpu.transpose %19, [1, 0] : vector<16x1xf32> -> vector<1x16xf32>
    %21 = vector.broadcast %18 : vector<16x1xf32> to vector<16x16xf32>
    %22 = vector.broadcast %20 : vector<1x16xf32> to vector<16x16xf32>
    %23 = arith.addf %21, %22 : vector<16x16xf32>
    %cst_16 = arith.constant 0.000000e+00 : f32
    %24 = vector.broadcast %cst_16 : f32 to vector<16x16xf32>
    %25 = arith.cmpf ogt, %23, %24 : vector<16x16xf32>
    %cst_17 = arith.constant 2.000000e-01 : f32
    %26 = vector.broadcast %cst_17 : f32 to vector<16x16xf32>
    %27 = arith.mulf %26, %23 : vector<16x16xf32>
    %28 = arith.select %25, %23, %27 : vector<16x16xi1>, vector<16x16xf32>
    %29 = arith.addf %28, %0 : vector<16x16xf32>
    %cst_18 = arith.constant dense<0xFF800000> : vector<16xf32>
    %30 = vector.multi_reduction <maximumf>, %29, %cst_18 [1] : vector<16x16xf32> to vector<16xf32>
    %31 = vector.shape_cast %30 : vector<16xf32> to vector<16x1xf32>
    %32 = vector.broadcast %31 : vector<16x1xf32> to vector<16x16xf32>
    %33 = arith.subf %29, %32 : vector<16x16xf32>
    %34 = math.exp %33 : vector<16x16xf32>
    %cst_19 = arith.constant dense<0.000000e+00> : vector<16xf32>
    %35 = vector.multi_reduction <add>, %34, %cst_19 [1] : vector<16x16xf32> to vector<16xf32>
    %36 = vector.shape_cast %35 : vector<16xf32> to vector<16x1xf32>
    %37 = tpu.reciprocal %36 {approx = true} : vector<16x1xf32> -> vector<16x1xf32>
    %38 = vector.broadcast %37 : vector<16x1xf32> to vector<16x16xf32>
    %39 = arith.mulf %34, %38 : vector<16x16xf32>
    %40 = arith.truncf %39 : vector<16x16xf32> to vector<16x16xbf16>
    %41 = vector.extract_strided_slice %14 {offsets = [0, 0], sizes = [16, 16], strides = [1, 1]} : vector<16x32xbf16> to vector<16x16xbf16>
    %cst_20 = arith.constant dense<0.000000e+00> : vector<16x16xf32>
    %42 = tpu.matmul %40, %41, %cst_20 {dimension_numbers = #tpu.dot_dimension_numbers<[1], [0], [0], [1], [0, 0, 1, 1], [], []>} : vector<16x16xbf16>, vector<16x16xbf16>, vector<16x16xf32> -> vector<16x16xf32>
    %cst_21 = arith.constant 0.000000e+00 : f32
    %43 = vector.broadcast %cst_21 : f32 to vector<16x16xf32>
    %44 = arith.cmpf ogt, %42, %43 : vector<16x16xf32>
    %cst_22 = arith.constant 0.000000e+00 : f32
    %45 = vector.broadcast %cst_22 : f32 to vector<16x16xf32>
    %46 = arith.minimumf %42, %45 : vector<16x16xf32>
    %47 = math.exp %46 : vector<16x16xf32>
    %cst_23 = arith.constant 1.000000e+00 : f32
    %48 = vector.broadcast %cst_23 : f32 to vector<16x16xf32>
    %49 = arith.subf %47, %48 : vector<16x16xf32>
    %50 = arith.select %44, %42, %49 : vector<16x16xi1>, vector<16x16xf32>
    %51 = arith.index_cast %c0_i32 : i32 to index
    %c0_24 = arith.constant 0 : index
    %c0_25 = arith.constant 0 : index
    %52 = vector.load %arg8[%51, %c0_24, %c0_25] : memref<2x16x32xf32, #tpu.memory_space<vmem>>, vector<1x16x16xf32>
    %53 = vector.shape_cast %52 : vector<1x16x16xf32> to vector<16x16xf32>
    %54 = vector.shape_cast %50 : vector<16x16xf32> to vector<1x16x16xf32>
    tpu.vector_store %arg8[%51, %c0_24, %c0_25], %54 {strides = array<i32>} : memref<2x16x32xf32, #tpu.memory_space<vmem>>, vector<1x16x16xf32>,
    %55 = vector.extract_strided_slice %17 {offsets = [0, 1], sizes = [16, 1], strides = [1, 1]} : vector<16x4xf32> to vector<16x1xf32>
    %56 = vector.extract_strided_slice %17 {offsets = [0, 3], sizes = [16, 1], strides = [1, 1]} : vector<16x4xf32> to vector<16x1xf32>
    %57 = tpu.transpose %56, [1, 0] : vector<16x1xf32> -> vector<1x16xf32>
    %58 = vector.broadcast %55 : vector<16x1xf32> to vector<16x16xf32>
    %59 = vector.broadcast %57 : vector<1x16xf32> to vector<16x16xf32>
    %60 = arith.addf %58, %59 : vector<16x16xf32>
    %cst_26 = arith.constant 0.000000e+00 : f32
    %61 = vector.broadcast %cst_26 : f32 to vector<16x16xf32>
    %62 = arith.cmpf ogt, %60, %61 : vector<16x16xf32>
    %cst_27 = arith.constant 2.000000e-01 : f32
    %63 = vector.broadcast %cst_27 : f32 to vector<16x16xf32>
    %64 = arith.mulf %63, %60 : vector<16x16xf32>
    %65 = arith.select %62, %60, %64 : vector<16x16xi1>, vector<16x16xf32>
    %66 = arith.addf %65, %0 : vector<16x16xf32>
    %cst_28 = arith.constant dense<0xFF800000> : vector<16xf32>
    %67 = vector.multi_reduction <maximumf>, %66, %cst_28 [1] : vector<16x16xf32> to vector<16xf32>
    %68 = vector.shape_cast %67 : vector<16xf32> to vector<16x1xf32>
    %69 = vector.broadcast %68 : vector<16x1xf32> to vector<16x16xf32>
    %70 = arith.subf %66, %69 : vector<16x16xf32>
    %71 = math.exp %70 : vector<16x16xf32>
    %cst_29 = arith.constant dense<0.000000e+00> : vector<16xf32>
    %72 = vector.multi_reduction <add>, %71, %cst_29 [1] : vector<16x16xf32> to vector<16xf32>
    %73 = vector.shape_cast %72 : vector<16xf32> to vector<16x1xf32>
    %74 = tpu.reciprocal %73 {approx = true} : vector<16x1xf32> -> vector<16x1xf32>
    %75 = vector.broadcast %74 : vector<16x1xf32> to vector<16x16xf32>
    %76 = arith.mulf %71, %75 : vector<16x16xf32>
    %77 = arith.truncf %76 : vector<16x16xf32> to vector<16x16xbf16>
    %78 = vector.extract_strided_slice %14 {offsets = [0, 16], sizes = [16, 16], strides = [1, 1]} : vector<16x32xbf16> to vector<16x16xbf16>
    %cst_30 = arith.constant dense<0.000000e+00> : vector<16x16xf32>
    %79 = tpu.matmul %77, %78, %cst_30 {dimension_numbers = #tpu.dot_dimension_numbers<[1], [0], [0], [1], [0, 0, 1, 1], [], []>} : vector<16x16xbf16>, vector<16x16xbf16>, vector<16x16xf32> -> vector<16x16xf32>
    %cst_31 = arith.constant 0.000000e+00 : f32
    %80 = vector.broadcast %cst_31 : f32 to vector<16x16xf32>
    %81 = arith.cmpf ogt, %79, %80 : vector<16x16xf32>
    %cst_32 = arith.constant 0.000000e+00 : f32
    %82 = vector.broadcast %cst_32 : f32 to vector<16x16xf32>
    %83 = arith.minimumf %79, %82 : vector<16x16xf32>
    %84 = math.exp %83 : vector<16x16xf32>
    %cst_33 = arith.constant 1.000000e+00 : f32
    %85 = vector.broadcast %cst_33 : f32 to vector<16x16xf32>
    %86 = arith.subf %84, %85 : vector<16x16xf32>
    %87 = arith.select %81, %79, %86 : vector<16x16xi1>, vector<16x16xf32>
    %88 = arith.index_cast %c0_i32 : i32 to index
    %c0_34 = arith.constant 0 : index
    %c16 = arith.constant 16 : index
    %89 = vector.load %arg8[%88, %c0_34, %c16] : memref<2x16x32xf32, #tpu.memory_space<vmem>>, vector<1x16x16xf32>
    %90 = vector.shape_cast %89 : vector<1x16x16xf32> to vector<16x16xf32>
    %91 = vector.shape_cast %87 : vector<16x16xf32> to vector<1x16x16xf32>
    tpu.vector_store %arg8[%88, %c0_34, %c16], %91 {strides = array<i32>} : memref<2x16x32xf32, #tpu.memory_space<vmem>>, vector<1x16x16xf32>,
    %c1_i32 = arith.constant 1 : i32
    %92 = arith.index_cast %c1_i32 : i32 to index
    %c0_35 = arith.constant 0 : index
    %c0_36 = arith.constant 0 : index
    %93 = vector.load %arg6[%92, %c0_35, %c0_36] : memref<2x16x32xbf16, #tpu.memory_space<vmem>>, vector<1x16x32xbf16>
    %94 = vector.shape_cast %93 : vector<1x16x32xbf16> to vector<16x32xbf16>
    %95 = arith.index_cast %c1_i32 : i32 to index
    %c0_37 = arith.constant 0 : index
    %c0_38 = arith.constant 0 : index
    %96 = vector.load %arg7[%95, %c0_37, %c0_38] : memref<2x16x4xf32, #tpu.memory_space<vmem>>, vector<1x16x4xf32>
    %97 = vector.shape_cast %96 : vector<1x16x4xf32> to vector<16x4xf32>
    %98 = vector.extract_strided_slice %97 {offsets = [0, 0], sizes = [16, 1], strides = [1, 1]} : vector<16x4xf32> to vector<16x1xf32>
    %99 = vector.extract_strided_slice %97 {offsets = [0, 2], sizes = [16, 1], strides = [1, 1]} : vector<16x4xf32> to vector<16x1xf32>
    %100 = tpu.transpose %99, [1, 0] : vector<16x1xf32> -> vector<1x16xf32>
    %101 = vector.broadcast %98 : vector<16x1xf32> to vector<16x16xf32>
    %102 = vector.broadcast %100 : vector<1x16xf32> to vector<16x16xf32>
    %103 = arith.addf %101, %102 : vector<16x16xf32>
    %cst_39 = arith.constant 0.000000e+00 : f32
    %104 = vector.broadcast %cst_39 : f32 to vector<16x16xf32>
    %105 = arith.cmpf ogt, %103, %104 : vector<16x16xf32>
    %cst_40 = arith.constant 2.000000e-01 : f32
    %106 = vector.broadcast %cst_40 : f32 to vector<16x16xf32>
    %107 = arith.mulf %106, %103 : vector<16x16xf32>
    %108 = arith.select %105, %103, %107 : vector<16x16xi1>, vector<16x16xf32>
    %109 = arith.addf %108, %0 : vector<16x16xf32>
    %cst_41 = arith.constant dense<0xFF800000> : vector<16xf32>
    %110 = vector.multi_reduction <maximumf>, %109, %cst_41 [1] : vector<16x16xf32> to vector<16xf32>
    %111 = vector.shape_cast %110 : vector<16xf32> to vector<16x1xf32>
    %112 = vector.broadcast %111 : vector<16x1xf32> to vector<16x16xf32>
    %113 = arith.subf %109, %112 : vector<16x16xf32>
    %114 = math.exp %113 : vector<16x16xf32>
    %cst_42 = arith.constant dense<0.000000e+00> : vector<16xf32>
    %115 = vector.multi_reduction <add>, %114, %cst_42 [1] : vector<16x16xf32> to vector<16xf32>
    %116 = vector.shape_cast %115 : vector<16xf32> to vector<16x1xf32>
    %117 = tpu.reciprocal %116 {approx = true} : vector<16x1xf32> -> vector<16x1xf32>
    %118 = vector.broadcast %117 : vector<16x1xf32> to vector<16x16xf32>
    %119 = arith.mulf %114, %118 : vector<16x16xf32>
    %120 = arith.truncf %119 : vector<16x16xf32> to vector<16x16xbf16>
    %121 = vector.extract_strided_slice %94 {offsets = [0, 0], sizes = [16, 16], strides = [1, 1]} : vector<16x32xbf16> to vector<16x16xbf16>
    %cst_43 = arith.constant dense<0.000000e+00> : vector<16x16xf32>
    %122 = tpu.matmul %120, %121, %cst_43 {dimension_numbers = #tpu.dot_dimension_numbers<[1], [0], [0], [1], [0, 0, 1, 1], [], []>} : vector<16x16xbf16>, vector<16x16xbf16>, vector<16x16xf32> -> vector<16x16xf32>
    %cst_44 = arith.constant 0.000000e+00 : f32
    %123 = vector.broadcast %cst_44 : f32 to vector<16x16xf32>
    %124 = arith.cmpf ogt, %122, %123 : vector<16x16xf32>
    %cst_45 = arith.constant 0.000000e+00 : f32
    %125 = vector.broadcast %cst_45 : f32 to vector<16x16xf32>
    %126 = arith.minimumf %122, %125 : vector<16x16xf32>
    %127 = math.exp %126 : vector<16x16xf32>
    %cst_46 = arith.constant 1.000000e+00 : f32
    %128 = vector.broadcast %cst_46 : f32 to vector<16x16xf32>
    %129 = arith.subf %127, %128 : vector<16x16xf32>
    %130 = arith.select %124, %122, %129 : vector<16x16xi1>, vector<16x16xf32>
    %131 = arith.index_cast %c1_i32 : i32 to index
    %c0_47 = arith.constant 0 : index
    %c0_48 = arith.constant 0 : index
    %132 = vector.load %arg8[%131, %c0_47, %c0_48] : memref<2x16x32xf32, #tpu.memory_space<vmem>>, vector<1x16x16xf32>
    %133 = vector.shape_cast %132 : vector<1x16x16xf32> to vector<16x16xf32>
    %134 = vector.shape_cast %130 : vector<16x16xf32> to vector<1x16x16xf32>
    tpu.vector_store %arg8[%131, %c0_47, %c0_48], %134 {strides = array<i32>} : memref<2x16x32xf32, #tpu.memory_space<vmem>>, vector<1x16x16xf32>,
    %135 = vector.extract_strided_slice %97 {offsets = [0, 1], sizes = [16, 1], strides = [1, 1]} : vector<16x4xf32> to vector<16x1xf32>
    %136 = vector.extract_strided_slice %97 {offsets = [0, 3], sizes = [16, 1], strides = [1, 1]} : vector<16x4xf32> to vector<16x1xf32>
    %137 = tpu.transpose %136, [1, 0] : vector<16x1xf32> -> vector<1x16xf32>
    %138 = vector.broadcast %135 : vector<16x1xf32> to vector<16x16xf32>
    %139 = vector.broadcast %137 : vector<1x16xf32> to vector<16x16xf32>
    %140 = arith.addf %138, %139 : vector<16x16xf32>
    %cst_49 = arith.constant 0.000000e+00 : f32
    %141 = vector.broadcast %cst_49 : f32 to vector<16x16xf32>
    %142 = arith.cmpf ogt, %140, %141 : vector<16x16xf32>
    %cst_50 = arith.constant 2.000000e-01 : f32
    %143 = vector.broadcast %cst_50 : f32 to vector<16x16xf32>
    %144 = arith.mulf %143, %140 : vector<16x16xf32>
    %145 = arith.select %142, %140, %144 : vector<16x16xi1>, vector<16x16xf32>
    %146 = arith.addf %145, %0 : vector<16x16xf32>
    %cst_51 = arith.constant dense<0xFF800000> : vector<16xf32>
    %147 = vector.multi_reduction <maximumf>, %146, %cst_51 [1] : vector<16x16xf32> to vector<16xf32>
    %148 = vector.shape_cast %147 : vector<16xf32> to vector<16x1xf32>
    %149 = vector.broadcast %148 : vector<16x1xf32> to vector<16x16xf32>
    %150 = arith.subf %146, %149 : vector<16x16xf32>
    %151 = math.exp %150 : vector<16x16xf32>
    %cst_52 = arith.constant dense<0.000000e+00> : vector<16xf32>
    %152 = vector.multi_reduction <add>, %151, %cst_52 [1] : vector<16x16xf32> to vector<16xf32>
    %153 = vector.shape_cast %152 : vector<16xf32> to vector<16x1xf32>
    %154 = tpu.reciprocal %153 {approx = true} : vector<16x1xf32> -> vector<16x1xf32>
    %155 = vector.broadcast %154 : vector<16x1xf32> to vector<16x16xf32>
    %156 = arith.mulf %151, %155 : vector<16x16xf32>
    %157 = arith.truncf %156 : vector<16x16xf32> to vector<16x16xbf16>
    %158 = vector.extract_strided_slice %94 {offsets = [0, 16], sizes = [16, 16], strides = [1, 1]} : vector<16x32xbf16> to vector<16x16xbf16>
    %cst_53 = arith.constant dense<0.000000e+00> : vector<16x16xf32>
    %159 = tpu.matmul %157, %158, %cst_53 {dimension_numbers = #tpu.dot_dimension_numbers<[1], [0], [0], [1], [0, 0, 1, 1], [], []>} : vector<16x16xbf16>, vector<16x16xbf16>, vector<16x16xf32> -> vector<16x16xf32>
    %cst_54 = arith.constant 0.000000e+00 : f32
    %160 = vector.broadcast %cst_54 : f32 to vector<16x16xf32>
    %161 = arith.cmpf ogt, %159, %160 : vector<16x16xf32>
    %cst_55 = arith.constant 0.000000e+00 : f32
    %162 = vector.broadcast %cst_55 : f32 to vector<16x16xf32>
    %163 = arith.minimumf %159, %162 : vector<16x16xf32>
    %164 = math.exp %163 : vector<16x16xf32>
    %cst_56 = arith.constant 1.000000e+00 : f32
    %165 = vector.broadcast %cst_56 : f32 to vector<16x16xf32>
    %166 = arith.subf %164, %165 : vector<16x16xf32>
    %167 = arith.select %161, %159, %166 : vector<16x16xi1>, vector<16x16xf32>
    %168 = arith.index_cast %c1_i32 : i32 to index
    %c0_57 = arith.constant 0 : index
    %c16_58 = arith.constant 16 : index
    %169 = vector.load %arg8[%168, %c0_57, %c16_58] : memref<2x16x32xf32, #tpu.memory_space<vmem>>, vector<1x16x16xf32>
    %170 = vector.shape_cast %169 : vector<1x16x16xf32> to vector<16x16xf32>
    %171 = vector.shape_cast %167 : vector<16x16xf32> to vector<1x16x16xf32>
    tpu.vector_store %arg8[%168, %c0_57, %c16_58], %171 {strides = array<i32>} : memref<2x16x32xf32, #tpu.memory_space<vmem>>, vector<1x16x16xf32>,
    %c2_i32 = arith.constant 2 : i32
    %c0_59 = arith.constant 0 : index
    %c0_60 = arith.constant 0 : index
    %c0_61 = arith.constant 0 : index
    %172 = vector.load %arg8[%c0_59, %c0_60, %c0_61] : memref<2x16x32xf32, #tpu.memory_space<vmem>>, vector<2x16x32xf32>
    %173 = arith.truncf %172 : vector<2x16x32xf32> to vector<2x16x32xbf16>
    %174 = vector.shape_cast %173 : vector<2x16x32xbf16> to vector<32x32xbf16>
    %c0_62 = arith.constant 0 : index
    %c0_63 = arith.constant 0 : index
    %175 = vector.load %arg4[%c0_62, %c0_63] : memref<32x18xbf16, #tpu.memory_space<vmem>>, vector<32x18xbf16>
    %cst_64 = arith.constant dense<0.000000e+00> : vector<32x18xf32>
    %176 = tpu.matmul %174, %175, %cst_64 {dimension_numbers = #tpu.dot_dimension_numbers<[1], [0], [0], [1], [0, 0, 1, 1], [], []>} : vector<32x32xbf16>, vector<32x18xbf16>, vector<32x18xf32> -> vector<32x18xf32>
    %177 = vector.extract_strided_slice %176 {offsets = [0, 0], sizes = [32, 16], strides = [1, 1]} : vector<32x18xf32> to vector<32x16xf32>
    %178 = arith.truncf %177 : vector<32x16xf32> to vector<32x16xbf16>
    %179 = vector.shape_cast %178 : vector<32x16xbf16> to vector<2x16x16xbf16>
    %c0_65 = arith.constant 0 : index
    %c0_66 = arith.constant 0 : index
    %c0_67 = arith.constant 0 : index
    %180 = vector.load %arg9[%c0_65, %c0_66, %c0_67] : memref<2x16x16xbf16, #tpu.memory_space<vmem>>, vector<2x16x16xbf16>
    tpu.vector_store %arg9[%c0_65, %c0_66, %c0_67], %179 {strides = array<i32>} : memref<2x16x16xbf16, #tpu.memory_space<vmem>>, vector<2x16x16xbf16>,
    %181 = vector.extract_strided_slice %176 {offsets = [0, 16], sizes = [32, 2], strides = [1, 1]} : vector<32x18xf32> to vector<32x2xf32>
    %182 = vector.shape_cast %181 : vector<32x2xf32> to vector<2x16x2xf32>
    %c0_68 = arith.constant 0 : index
    %c0_69 = arith.constant 0 : index
    %c0_70 = arith.constant 0 : index
    %183 = vector.load %arg10[%c0_68, %c0_69, %c0_70] : memref<2x16x2xf32, #tpu.memory_space<vmem>>, vector<2x16x2xf32>
    tpu.vector_store %arg10[%c0_68, %c0_69, %c0_70], %182 {strides = array<i32>} : memref<2x16x2xf32, #tpu.memory_space<vmem>>, vector<2x16x2xf32>,
    %c0_i32_71 = arith.constant 0 : i32
    %184 = arith.index_cast %c0_i32_71 : i32 to index
    %c0_72 = arith.constant 0 : index
    %c0_73 = arith.constant 0 : index
    %185 = vector.load %arg9[%184, %c0_72, %c0_73] : memref<2x16x16xbf16, #tpu.memory_space<vmem>>, vector<1x16x16xbf16>
    %186 = vector.shape_cast %185 : vector<1x16x16xbf16> to vector<16x16xbf16>
    %187 = arith.index_cast %c0_i32_71 : i32 to index
    %c0_74 = arith.constant 0 : index
    %c0_75 = arith.constant 0 : index
    %188 = vector.load %arg10[%187, %c0_74, %c0_75] : memref<2x16x2xf32, #tpu.memory_space<vmem>>, vector<1x16x2xf32>
    %189 = vector.shape_cast %188 : vector<1x16x2xf32> to vector<16x2xf32>
    %190 = vector.extract_strided_slice %189 {offsets = [0, 0], sizes = [16, 1], strides = [1, 1]} : vector<16x2xf32> to vector<16x1xf32>
    %191 = vector.extract_strided_slice %189 {offsets = [0, 1], sizes = [16, 1], strides = [1, 1]} : vector<16x2xf32> to vector<16x1xf32>
    %192 = tpu.transpose %191, [1, 0] : vector<16x1xf32> -> vector<1x16xf32>
    %193 = vector.broadcast %190 : vector<16x1xf32> to vector<16x16xf32>
    %194 = vector.broadcast %192 : vector<1x16xf32> to vector<16x16xf32>
    %195 = arith.addf %193, %194 : vector<16x16xf32>
    %cst_76 = arith.constant 0.000000e+00 : f32
    %196 = vector.broadcast %cst_76 : f32 to vector<16x16xf32>
    %197 = arith.cmpf ogt, %195, %196 : vector<16x16xf32>
    %cst_77 = arith.constant 2.000000e-01 : f32
    %198 = vector.broadcast %cst_77 : f32 to vector<16x16xf32>
    %199 = arith.mulf %198, %195 : vector<16x16xf32>
    %200 = arith.select %197, %195, %199 : vector<16x16xi1>, vector<16x16xf32>
    %201 = arith.addf %200, %0 : vector<16x16xf32>
    %cst_78 = arith.constant dense<0xFF800000> : vector<16xf32>
    %202 = vector.multi_reduction <maximumf>, %201, %cst_78 [1] : vector<16x16xf32> to vector<16xf32>
    %203 = vector.shape_cast %202 : vector<16xf32> to vector<16x1xf32>
    %204 = vector.broadcast %203 : vector<16x1xf32> to vector<16x16xf32>
    %205 = arith.subf %201, %204 : vector<16x16xf32>
    %206 = math.exp %205 : vector<16x16xf32>
    %cst_79 = arith.constant dense<0.000000e+00> : vector<16xf32>
    %207 = vector.multi_reduction <add>, %206, %cst_79 [1] : vector<16x16xf32> to vector<16xf32>
    %208 = vector.shape_cast %207 : vector<16xf32> to vector<16x1xf32>
    %209 = tpu.reciprocal %208 {approx = true} : vector<16x1xf32> -> vector<16x1xf32>
    %210 = vector.broadcast %209 : vector<16x1xf32> to vector<16x16xf32>
    %211 = arith.mulf %206, %210 : vector<16x16xf32>
    %212 = arith.truncf %211 : vector<16x16xf32> to vector<16x16xbf16>
    %cst_80 = arith.constant dense<0.000000e+00> : vector<16x16xf32>
    %213 = tpu.matmul %212, %186, %cst_80 {dimension_numbers = #tpu.dot_dimension_numbers<[1], [0], [0], [1], [0, 0, 1, 1], [], []>} : vector<16x16xbf16>, vector<16x16xbf16>, vector<16x16xf32> -> vector<16x16xf32>
    %cst_81 = arith.constant 0.000000e+00 : f32
    %214 = vector.broadcast %cst_81 : f32 to vector<16x16xf32>
    %215 = arith.cmpf ogt, %213, %214 : vector<16x16xf32>
    %cst_82 = arith.constant 0.000000e+00 : f32
    %216 = vector.broadcast %cst_82 : f32 to vector<16x16xf32>
    %217 = arith.minimumf %213, %216 : vector<16x16xf32>
    %218 = math.exp %217 : vector<16x16xf32>
    %cst_83 = arith.constant 1.000000e+00 : f32
    %219 = vector.broadcast %cst_83 : f32 to vector<16x16xf32>
    %220 = arith.subf %218, %219 : vector<16x16xf32>
    %221 = arith.select %215, %213, %220 : vector<16x16xi1>, vector<16x16xf32>
    %222 = arith.index_cast %c0_i32_71 : i32 to index
    %c0_84 = arith.constant 0 : index
    %c0_85 = arith.constant 0 : index
    %223 = vector.load %arg5[%222, %c0_84, %c0_85] : memref<2x16x16xf32, #tpu.memory_space<vmem>>, vector<1x16x16xf32>
    %224 = vector.shape_cast %223 : vector<1x16x16xf32> to vector<16x16xf32>
    %225 = vector.shape_cast %221 : vector<16x16xf32> to vector<1x16x16xf32>
    tpu.vector_store %arg5[%222, %c0_84, %c0_85], %225 {strides = array<i32>} : memref<2x16x16xf32, #tpu.memory_space<vmem>>, vector<1x16x16xf32>,
    %c1_i32_86 = arith.constant 1 : i32
    %226 = arith.index_cast %c1_i32_86 : i32 to index
    %c0_87 = arith.constant 0 : index
    %c0_88 = arith.constant 0 : index
    %227 = vector.load %arg9[%226, %c0_87, %c0_88] : memref<2x16x16xbf16, #tpu.memory_space<vmem>>, vector<1x16x16xbf16>
    %228 = vector.shape_cast %227 : vector<1x16x16xbf16> to vector<16x16xbf16>
    %229 = arith.index_cast %c1_i32_86 : i32 to index
    %c0_89 = arith.constant 0 : index
    %c0_90 = arith.constant 0 : index
    %230 = vector.load %arg10[%229, %c0_89, %c0_90] : memref<2x16x2xf32, #tpu.memory_space<vmem>>, vector<1x16x2xf32>
    %231 = vector.shape_cast %230 : vector<1x16x2xf32> to vector<16x2xf32>
    %232 = vector.extract_strided_slice %231 {offsets = [0, 0], sizes = [16, 1], strides = [1, 1]} : vector<16x2xf32> to vector<16x1xf32>
    %233 = vector.extract_strided_slice %231 {offsets = [0, 1], sizes = [16, 1], strides = [1, 1]} : vector<16x2xf32> to vector<16x1xf32>
    %234 = tpu.transpose %233, [1, 0] : vector<16x1xf32> -> vector<1x16xf32>
    %235 = vector.broadcast %232 : vector<16x1xf32> to vector<16x16xf32>
    %236 = vector.broadcast %234 : vector<1x16xf32> to vector<16x16xf32>
    %237 = arith.addf %235, %236 : vector<16x16xf32>
    %cst_91 = arith.constant 0.000000e+00 : f32
    %238 = vector.broadcast %cst_91 : f32 to vector<16x16xf32>
    %239 = arith.cmpf ogt, %237, %238 : vector<16x16xf32>
    %cst_92 = arith.constant 2.000000e-01 : f32
    %240 = vector.broadcast %cst_92 : f32 to vector<16x16xf32>
    %241 = arith.mulf %240, %237 : vector<16x16xf32>
    %242 = arith.select %239, %237, %241 : vector<16x16xi1>, vector<16x16xf32>
    %243 = arith.addf %242, %0 : vector<16x16xf32>
    %cst_93 = arith.constant dense<0xFF800000> : vector<16xf32>
    %244 = vector.multi_reduction <maximumf>, %243, %cst_93 [1] : vector<16x16xf32> to vector<16xf32>
    %245 = vector.shape_cast %244 : vector<16xf32> to vector<16x1xf32>
    %246 = vector.broadcast %245 : vector<16x1xf32> to vector<16x16xf32>
    %247 = arith.subf %243, %246 : vector<16x16xf32>
    %248 = math.exp %247 : vector<16x16xf32>
    %cst_94 = arith.constant dense<0.000000e+00> : vector<16xf32>
    %249 = vector.multi_reduction <add>, %248, %cst_94 [1] : vector<16x16xf32> to vector<16xf32>
    %250 = vector.shape_cast %249 : vector<16xf32> to vector<16x1xf32>
    %251 = tpu.reciprocal %250 {approx = true} : vector<16x1xf32> -> vector<16x1xf32>
    %252 = vector.broadcast %251 : vector<16x1xf32> to vector<16x16xf32>
    %253 = arith.mulf %248, %252 : vector<16x16xf32>
    %254 = arith.truncf %253 : vector<16x16xf32> to vector<16x16xbf16>
    %cst_95 = arith.constant dense<0.000000e+00> : vector<16x16xf32>
    %255 = tpu.matmul %254, %228, %cst_95 {dimension_numbers = #tpu.dot_dimension_numbers<[1], [0], [0], [1], [0, 0, 1, 1], [], []>} : vector<16x16xbf16>, vector<16x16xbf16>, vector<16x16xf32> -> vector<16x16xf32>
    %cst_96 = arith.constant 0.000000e+00 : f32
    %256 = vector.broadcast %cst_96 : f32 to vector<16x16xf32>
    %257 = arith.cmpf ogt, %255, %256 : vector<16x16xf32>
    %cst_97 = arith.constant 0.000000e+00 : f32
    %258 = vector.broadcast %cst_97 : f32 to vector<16x16xf32>
    %259 = arith.minimumf %255, %258 : vector<16x16xf32>
    %260 = math.exp %259 : vector<16x16xf32>
    %cst_98 = arith.constant 1.000000e+00 : f32
    %261 = vector.broadcast %cst_98 : f32 to vector<16x16xf32>
    %262 = arith.subf %260, %261 : vector<16x16xf32>
    %263 = arith.select %257, %255, %262 : vector<16x16xi1>, vector<16x16xf32>
    %264 = arith.index_cast %c1_i32_86 : i32 to index
    %c0_99 = arith.constant 0 : index
    %c0_100 = arith.constant 0 : index
    %265 = vector.load %arg5[%264, %c0_99, %c0_100] : memref<2x16x16xf32, #tpu.memory_space<vmem>>, vector<1x16x16xf32>
    %266 = vector.shape_cast %265 : vector<1x16x16xf32> to vector<16x16xf32>
    %267 = vector.shape_cast %263 : vector<16x16xf32> to vector<1x16x16xf32>
    tpu.vector_store %arg5[%264, %c0_99, %c0_100], %267 {strides = array<i32>} : memref<2x16x16xf32, #tpu.memory_space<vmem>>, vector<1x16x16xf32>,
    %c2_i32_101 = arith.constant 2 : i32
    return
  }
  func.func @transform_0(%arg0: i32) -> (i32, i32, i32) {
    %c0_i32 = arith.constant 0 : i32
    %c0_i32_0 = arith.constant 0 : i32
    %c0_i32_1 = arith.constant 0 : i32
    return %arg0, %c0_i32, %c0_i32_0 : i32, i32, i32
  }
  func.func @transform_1(%arg0: i32) -> (i32, i32) {
    %c0_i32 = arith.constant 0 : i32
    %c0_i32_0 = arith.constant 0 : i32
    %c0_i32_1 = arith.constant 0 : i32
    return %c0_i32, %c0_i32_0 : i32, i32
  }
  func.func @transform_2(%arg0: i32) -> (i32, i32) {
    %c0_i32 = arith.constant 0 : i32
    %c0_i32_0 = arith.constant 0 : i32
    %c0_i32_1 = arith.constant 0 : i32
    return %c0_i32, %c0_i32_0 : i32, i32
  }
  func.func @transform_3(%arg0: i32) -> (i32, i32) {
    %c0_i32 = arith.constant 0 : i32
    %c0_i32_0 = arith.constant 0 : i32
    %c0_i32_1 = arith.constant 0 : i32
    return %c0_i32, %c0_i32_0 : i32, i32
  }
  func.func @transform_4(%arg0: i32) -> (i32, i32, i32) {
    %c0_i32 = arith.constant 0 : i32
    %c0_i32_0 = arith.constant 0 : i32
    %c0_i32_1 = arith.constant 0 : i32
    return %arg0, %c0_i32, %c0_i32_0 : i32, i32, i32
  }
}

</mosaic_0001>

<bundles_post_ra>
// kernel: tpu_custom_call.1
= control target key start
LH: loop header
LB: loop body
LE: loop exit
PB: predicated region body
PF: predicated region fallthrough
CT: control target
= control target key end

     0   :  { %9 = vsyncpa [#allocation8], 0  ;;  %s1974_s0 = inlined_call_operand.vmem [shape: bf16[4,16,8], index: 0, kind: input, shape index: {}]   ;;  %s1975_s1 = inlined_call_operand.vmem [shape: f32[16,16], index: 1, kind: input, shape index: {}]   ;;  %s1976_s2 = inlined_call_operand.vmem [shape: bf16[8,36], index: 2, kind: input, shape index: {}]   ;;  %s1977_s3 = inlined_call_operand.vmem [shape: bf16[32,18], index: 3, kind: input, shape index: {}]   ;;  %s1978_s4 = inlined_call_operand.hbm [shape: f32[4,16,16], index: 4, kind: output, shape index: {}]  }
   0x1   :  { %11 = vsyncpa [#allocation8 + $0x1], 0  ;;  %s1733_s15 = smov 0   ;;  %s1735_s16 = smov 0  }
   0x2   :  { %s1737_s17 = smov 0   ;;  %s1739_s18 = smov 0  }
   0x3 LB: > { %s1754_s19 = sadd.s32 4294967295, %s1693_s18   ;;  %s1383_s20 = sadd.s32 4294967294, %s1693_s18   ;;  %s1693_s18 = sphi %s1739_s18, %s1984_s18   ;;  %s1689_s17 = sphi %s1737_s17, %s1983_s17   ;;  %s1685_s16 = sphi %s1735_s16, %s1982_s16   ;;  %s1681_s15 = sphi %s1733_s15, %s1981_s15  }
   0x4   : > { %s1758_s21 = sadd.s32 1, %s1693_s18   ;;  %s113_s22 = sadd.s32 1, %s1689_s17 }
   0x5   : > { %s110_s23 = ssub.s32 %s1693_s18, %s1758_s21  ;;  %p123_p0 = scmp.ne.s32.totalorder %s1689_s17, %s1685_s16 }
   0x6   : > { %p111_p1 = scmp.eq.s32.totalorder %s110_s23, 0  ;;  %p124_p2 = scmp.eq.s32.totalorder %s1754_s19, 1 }
   0x7   : > { %p129_p3 = scmp.ne.s32.totalorder %s1685_s16, %s1681_s15  ;;  %p130_p4 = scmp.eq.s32.totalorder %s1383_s20, 1 }
   0x8   : > { %s1769_s24 = scalar_select %p111_p1, %s1689_s17, %s113_s22  }
   0x9   : > { %p1771_p5 = por %p124_p2, %p123_p0  ;;  %p1775_p6 = por %p130_p4, %p129_p3 }
   0xa   : > { %p1386_p7 = scmp.ge.s32.totalorder %s1693_s18, 1  ;;  %p167_p8 = scmp.lt.s32.totalorder %s1693_s18, 3 }
   0xc   : > { %p168_p9 = pnand %p1386_p7, %p167_p8 }
   0xd   : > { %v209_v0 = vld [vmem:[%s1976_s2] sm:$0xf] (!%p168_p9)  ;;  %vm227_vm0 = vcmask (!%p168_p9), 1043456   ;;  %s1388_s29 = sshll.u32 (!%p168_p9), %s1754_s19, 1  ;;  %vm220_vm1 = vcmask (!%p168_p9), 64512   ;;  %v1695_v4 = vmov (!%p168_p9), 0.0   ;;  %v357_v35 = vlaneseq (!%p168_p9) }
   0xe   : > { %171 = sbr.rel (%p168_p9) target bundleno = 2557 (0x9fd), region = 36  ;;  %1497 = vmatprep.subr.msk.bf16.mxu0 (!%p168_p9), %vm227_vm0, %v209_v0  ;;  %v229_v1 = vsel (!%p168_p9), %vm227_vm0, %v209_v0, 0  ;;  %p195_p10 = scmp.lt.s32.totalorder (!%p168_p9), %s1388_s29, 3  ;;  %1453 = vmatprep.subr.bf16.mxu1 (!%p168_p9), %v1695_v4  ;;  %v1696_v5 = vmov (!%p168_p9), 1   ;;  %vm282_vm2 = vcmask (!%p168_p9), 261120   ;;  %vm301_vm3 = vcmask (!%p168_p9), 31744  }
   0xf   : > { %1448 = vmatpush3.bf16.msra.mxu0 (!%p168_p9), %v229_v1  ;;  %1549 = vset.pattern.permute.xlu1 (!%p168_p9), %v1696_v5  ;;  %s1697_s8 = smov (!%p168_p9), 96   ;;  %s1698_s9 = smov (!%p168_p9), 125   ;;  %v1699_v18 = vmov (!%p168_p9), 0   ;;  %v358_v37 = vshrl.u32 (!%p168_p9), %v357_v35, 7  ;;  %v1810_v45 = vld [vmem:[%s1975_s1 + $0x8] sm:$0xff] (!%p168_p9)  ;;  %v1815_v46 = vld [vmem:[%s1975_s1] sm:$0xff] (!%p168_p9) }
  0x10   : > { %1459 = vmatprep.subr.bf16.mxu0 (!%p168_p9), %v1695_v4  ;;  %1551 = vset.pattern.permute.xlu0 (!%p168_p9), %v1696_v5  ;;  %s1700_s10 = smov (!%p168_p9), 126   ;;  %vm371_vm6 = vcmask (!%p168_p9), 130048   ;;  %s1701_s20 = smov (!%p168_p9), 112   ;;  %vm1702_vm13 = vmmov (!%p168_p9), 0  }
  0x11   : > { %v1804_v39 = vsub.s32 (!%p168_p9), 0, %v358_v37  ;;  %1455 = vmatprep.mubr.msk.bf16.mxu1 (!%p168_p9), %vm1702_vm13, %v1695_v4  ;;  %s1703_s22 = smov (!%p168_p9), 16   ;;  %s191_s5 = sand.u32 (!%p168_p9), 1, %s1685_s16  }
  0x12   : > { %s1387_s6 = sshll.u32 (!%p168_p9), %s191_s5, 5  ;;  %s1705_s14 = smov (!%p168_p9), [#allocation7]  }
  0x15   : > { %s1986_s29 = smov (!%p195_p10, %s1388_s29), 3 }
  0x16   : > { %s1425_s30 = sshll.u32 %s1986_s29, 3 }
  0x17   : > { %s199_s7 = scalar_lea.vmem %s1974_s0, %s1425_s30  ;;  %s1704_s30 = smov 127  }
  0x18   : > { %v1555_v2 = vld [vmem:[%s199_s7] sm:$0xff]   ;;  %v1556_v3 = vld [vmem:[%s199_s7 + $0x8] sm:$0xff]   ;;  %s193_s7 = scalar_lea.vmem [#allocation7], %s1387_s6 }
  0x19   : > { %1449 = vmatprep.mubr.msk.bf16.mxu0 %vm220_vm1, %v1555_v2 }
  0x1a   : > { %1450 = vmatmul.mubr.msk.bf16.vlgmr.msra.gmra.mrb[0].mxu0 %vm220_vm1, %v1556_v3 }
  0x1b   : > { %1461 = vmatprep.mubr.msk.bf16.mxu0 %vm1702_vm13, %v1695_v4 }
  0xed   : > { %v1451_v6 = vpop.f32.mrb[0].mxu0 }
  0xee   : > { %293 = vrot.lane.b32.xlu1 %v1451_v6, %s1697_s8  ;;  %v265_v7 = vpop.f32.mrb[1].mxu0 }
  0xef   : > { %289 = vrot.lane.b32.xlu0 %v265_v7, %s1697_s8  ;;  %v1452_v8 = vpop.f32.mrb[2].mxu0 }
  0xf0   : > { %v281_v9 = vpack.c.bf16 %v1452_v8, %v1451_v6  ;;  %v268_v10 = vpop.f32.mrb[3].mxu0 }
  0xf1   : > { %v280_v11 = vpack.c.bf16 %v268_v10, %v265_v7 }
  0xf2   : > { %284 = vst.msk [vmem:[#allocation2 + $0x8] sm:$0xff] %vm282_vm2, %v281_v9  ;;  %295 = vrot.lane.b32.xlu1 %v1452_v8, %s1697_s8 }
  0xf3   : > { %283 = vst.msk [vmem:[#allocation2] sm:$0xff] %vm282_vm2, %v280_v11  ;;  %291 = vrot.lane.b32.xlu0 %v268_v10, %s1697_s8  ;;  %s1321_s8 = sshll.u32 %s193_s7, 4  ;;  %s1924_s8 = int_to_ptr.vmem [resolvable:$true] %s1321_s8 }
  0xf4   : > { %s1631_s13 = scalar_lea.vmem %s1924_s8, 512 }
  0xf5   : > { %p1632_p11 = scmp.ne.s32.totalorder %s1924_s8, %s1631_s13 }
  0xf7   : > { %p1633_p12 = pnand %p1632_p11, %p1771_p5 }
  0xf9   : > { %p1634_p13 = pneg %p1633_p12 }
  0xfa   : > { %v1792_v12 = vld [vmem:[#allocation2] sm:$0xff] }
  0xfb   : > { %1454 = vmatpush3.bf16.msra.mxu1 %v1792_v12 }
  0xfc   : > { %1465 = vmatprep.subr.bf16.mxu1 %v1695_v4 }
 0x160   : > { %v294_v13 = vpop.permute.xlu1 %293 }
 0x161   : > { %304 = vst.msk [vmem:[#allocation3 + $0x10] sm:$0xff] %vm301_vm3, %v294_v13  ;;  %v290_v14 = vpop.permute.xlu0 %289 }
 0x162   : > { %302 = vst.msk [vmem:[#allocation3] sm:$0xff] %vm301_vm3, %v290_v14 }
 0x164   : > { %v296_v15 = vpop.permute.xlu1 %295 }
 0x165   : > { %305 = vst.msk [vmem:[#allocation3 + $0x18] sm:$0xff] %vm301_vm3, %v296_v15  ;;  %v292_v16 = vpop.permute.xlu0 %291 }
 0x166   : > { %303 = vst.msk [vmem:[#allocation3 + $0x8] sm:$0xff] %vm301_vm3, %v292_v16 }
 0x168   : > { %v610_v17 = vld [vmem:[#allocation3 + $0x10] sm:$0xff] }
 0x169   : > { %795 = vperm.xlu1 %1549, %v610_v17   ;;  %756 = vrot.lane.b32.xlu0 %v610_v17, %s1698_s9  ;;  %v307_v19 = vld [vmem:[#allocation3] sm:$0xff] }
 0x16c   : > { %v611_v20 = vld [vmem:[#allocation3 + $0x18] sm:$0xff] }
 0x16d   : > { %1550 = vset.pattern.permute.xlu1 %v1699_v18  ;;  %614 = vrot.lane.b32.xlu0 %v610_v17, %s1700_s10  ;;  %v308_v21 = vld [vmem:[#allocation3 + $0x8] sm:$0xff] }
 0x16e   : > { %653 = vperm.xlu1 %1550, %v610_v17  }
 0x171   : > { %453 = vrot.lane.b32.xlu0 %v307_v19, %s1698_s9 }
 0x172   : > { %311 = vrot.lane.b32.xlu1 %v307_v19, %s1700_s10 }
 0x175   : > { %492 = vperm.xlu0 %1551, %v307_v19  }
 0x176   : > { %350 = vperm.xlu1 %1550, %v307_v19  }
 0x179   : > { %799 = vperm.xlu0 %1551, %v611_v20  }
 0x17a   : > { %758 = vrot.lane.b32.xlu1 %v611_v20, %s1698_s9 }
 0x17d   : > { %616 = vrot.lane.b32.xlu0 %v611_v20, %s1700_s10 }
 0x17e   : > { %657 = vperm.xlu1 %1550, %v611_v20   ;;  %1553 = vset.pattern.permute.xlu0 %v1699_v18 }
 0x181   : > { %313 = vrot.lane.b32.xlu0 %v308_v21, %s1700_s10 }
 0x182   : > { %455 = vrot.lane.b32.xlu1 %v308_v21, %s1698_s9  ;;  %s1427_s9 = sshll.u32 %s1754_s19, 9  ;;  %s1933_s19 = scalar_lea.sflag [#allocation8], %s191_s5 }
 0x183   : > { %1552 = vset.pattern.permute.xlu1 %v1696_v5  ;;  %s1930_s12 = scalar_lea.hbm %s1978_s4, %s1427_s9 }
 0x185   : > { %354 = vperm.xlu0 %1553, %v308_v21  }
 0x186   : > { %496 = vperm.xlu1 %1552, %v308_v21  }
 0x1db   : > { %v757_v22 = vpop.permute.xlu0 %756 }
 0x1dc   : > { %762 = vxpose.xlu0.b32.start [1/2] (short) (narrow) %v757_v22, 8 }
 0x1df   : > { %v615_v23 = vpop.permute.xlu0 %614 }
 0x1e3   : > { %v454_v24 = vpop.permute.xlu0 %453 }
 0x1e4   : > { %459 = vxpose.xlu1.b32.start [1/2] (short) (narrow) %v454_v24, 8 }
 0x1e8   : > { %v796_v25 = vpop.permute.xlu1 %795 }
 0x1ed   : > { %v1798_v26 = vpop.permute.xlu1 %653 }
 0x1f1   : > { %v312_v27 = vpop.permute.xlu1 %311 }
 0x1f4   : > { %v493_v32 = vpop.permute.xlu0 %492 }
 0x1f5   : > { %v1800_v28 = vpop.permute.xlu1 %350 }
 0x1f8   : > { %v800_v33 = vpop.permute.xlu0 %799 }
 0x1f9   : > { %v759_v29 = vpop.permute.xlu1 %758 }
 0x1fa   : > { %763 = vxpose.xlu0.b32.end [2/2] (short) (narrow) %v759_v29, 8 }
 0x1fc   : > { %v617_v34 = vpop.permute.xlu0 %616 }
 0x1fd   : > { %v1802_v30 = vpop.permute.xlu1 %657 }
 0x200   : > { %v314_v36 = vpop.permute.xlu0 %313 }
 0x201   : > { %v456_v31 = vpop.permute.xlu1 %455 }
 0x202   : > { %460 = vxpose.xlu1.b32.end [2/2] (short) (narrow) %v456_v31, 8 }
 0x204   : > { %v355_v38 = vpop.permute.xlu0 %354 }
 0x205   : > { %v497_v44 = vpop.permute.xlu1 %496 }
 0x276   : > { %v778_v40 = vpop.trf.xlu0 }
 0x277   : > { %v805_v41 = vrot.slane %v778_v40, %v1804_v39 }
 0x279   : > { %v806_v42 = vadd.f32 %v805_v41, %v796_v25  ;;  %v807_v43 = vadd.f32 %v805_v41, %v800_v33 }
 0x27b   : > { %v810_v47 = vmul.f32 0.2, %v806_v42  ;;  %v811_v48 = vmul.f32 0.2, %v807_v43  ;;  %vm809_vm4 = vcmp.gt.f32.partialorder %v807_v43, 0.0  ;;  %vm808_vm5 = vcmp.gt.f32.partialorder %v806_v42, 0.0 }
 0x27d   : > { %v813_v49 = vsel %vm809_vm4, %v807_v43, %v811_v48  ;;  %v812_v50 = vsel %vm808_vm5, %v806_v42, %v810_v47  ;;  %vm604_vm4 = vcmask 261248  }
 0x27e   : > { %v475_v51 = vpop.trf.xlu1  ;;  %v815_v52 = vadd.f32 %v813_v49, %v1810_v45  ;;  %v814_v53 = vadd.f32 %v812_v50, %v1815_v46 }
 0x27f   : > { %v502_v54 = vrot.slane %v475_v51, %v1804_v39 }
 0x280   : > { %v819_v55 = vsel %vm371_vm6, %v815_v52, -inf  ;;  %v816_v56 = vsel %vm371_vm6, %v814_v53, -inf }
 0x281   : > { %v503_v57 = vadd.f32 %v502_v54, %v493_v32  ;;  %v504_v58 = vadd.f32 %v502_v54, %v497_v44  ;;  %820 = vmax.xlane.f32.xlu1 %v819_v55  ;;  %817 = vmax.xlane.f32.xlu0 %v816_v56 }
 0x283   : > { %v507_v59 = vmul.f32 0.2, %v503_v57  ;;  %v508_v60 = vmul.f32 0.2, %v504_v58  ;;  %vm505_vm7 = vcmp.gt.f32.partialorder %v503_v57, 0.0  ;;  %vm506_vm8 = vcmp.gt.f32.partialorder %v504_v58, 0.0 }
 0x285   : > { %v509_v61 = vsel %vm505_vm7, %v503_v57, %v507_v59  ;;  %v510_v62 = vsel %vm506_vm8, %v504_v58, %v508_v60 }
 0x286   : > { %v511_v63 = vadd.f32 %v509_v61, %v1815_v46  ;;  %v512_v0 = vadd.f32 %v510_v62, %v1810_v45 }
 0x288   : > { %v513_v1 = vsel %vm371_vm6, %v511_v63, -inf  ;;  %v516_v2 = vsel %vm371_vm6, %v512_v0, -inf }
 0x289   : > { %514 = vmax.xlane.f32.xlu1 %v513_v1  ;;  %517 = vmax.xlane.f32.xlu0 %v516_v2 }
 0x2b6   : > { %317 = vxpose.xlu0.b32.start [1/2] (short) (narrow) %v312_v27, 8 }
 0x2ba   : > { %318 = vxpose.xlu0.b32.end [2/2] (short) (narrow) %v314_v36, 8 }
 0x2bc   : > { %620 = vxpose.xlu1.b32.start [1/2] (short) (narrow) %v615_v23, 8 }
 0x2c0   : > { %621 = vxpose.xlu1.b32.end [2/2] (short) (narrow) %v617_v34, 8 }
 0x2de   : > { %1554 = vset.pattern.permute.xlu1 %v1699_v18 }
 0x30e   : > { %v818_v3 = vpop.xlane.xlu0 %817  ;;  %v821_v5 = vpop.xlane.xlu1 %820 }
 0x30f   : > { %v823_v8 = vsub.f32 %v815_v52, %v821_v5  ;;  %v822_v9 = vsub.f32 %v814_v53, %v818_v3  ;;  %v1850_v52 = vld [vmem:[#allocation2 + $0x8] sm:$0xff] }
 0x311   : > { %v826_v14 = vmul.f32 1.442695, %v823_v8  ;;  %v824_v16 = vmul.f32 1.442695, %v822_v9 }
 0x313   : > { %1559 = vpow2.f32 %v826_v14 }
 0x314   : > { %1561 = vpow2.f32 %v824_v16 }
 0x316   : > { %v518_v6 = vpop.xlane.xlu0 %517  ;;  %v515_v7 = vpop.xlane.xlu1 %514 }
 0x317   : > { %v519_v10 = vsub.f32 %v511_v63, %v515_v7  ;;  %v520_v15 = vsub.f32 %v512_v0, %v518_v6 }
 0x319   : > { %v521_v20 = vmul.f32 1.442695, %v519_v10  ;;  %v523_v18 = vmul.f32 1.442695, %v520_v15 }
 0x31b   : > { %1563 = vpow2.f32 %v521_v20 }
 0x31c   : > { %1565 = vpow2.f32 %v523_v18 }
 0x336   : > { %v333_v11 = vpop.trf.xlu0 }
 0x337   : > { %v360_v13 = vrot.slane %v333_v11, %v1804_v39 }
 0x339   : > { %v361_v17 = vadd.f32 %v360_v13, %v1800_v28  ;;  %v362_v19 = vadd.f32 %v360_v13, %v355_v38 }
 0x33b   : > { %v365_v21 = vmul.f32 0.2, %v361_v17  ;;  %v366_v22 = vmul.f32 0.2, %v362_v19  ;;  %vm364_vm9 = vcmp.gt.f32.partialorder %v362_v19, 0.0  ;;  %vm363_vm10 = vcmp.gt.f32.partialorder %v361_v17, 0.0 }
 0x33c   : > { %v636_v23 = vpop.trf.xlu1 }
 0x33d   : > { %v663_v24 = vrot.slane %v636_v23, %v1804_v39  ;;  %v368_v25 = vsel %vm364_vm9, %v362_v19, %v366_v22  ;;  %v367_v27 = vsel %vm363_vm10, %v361_v17, %v365_v21 }
 0x33e   : > { %v370_v29 = vadd.f32 %v368_v25, %v1810_v45  ;;  %v369_v31 = vadd.f32 %v367_v27, %v1815_v46 }
 0x33f   : > { %v664_v28 = vadd.f32 %v663_v24, %v1798_v26  ;;  %v665_v32 = vadd.f32 %v663_v24, %v1802_v30  ;;  %v1838_v26 = vpop.eup %1559 }
 0x340   : > { %v375_v33 = vsel %vm371_vm6, %v370_v29, -inf  ;;  %v372_v34 = vsel %vm371_vm6, %v369_v31, -inf  ;;  %v1842_v43 = vpop.eup %1561  ;;  %v831_v48 = vsel %vm371_vm6, %v1838_v26, 0.0 }
 0x341   : > { %v668_v35 = vmul.f32 0.2, %v664_v28  ;;  %v669_v36 = vmul.f32 0.2, %v665_v32  ;;  %376 = vmax.xlane.f32.xlu1 %v375_v33  ;;  %373 = vmax.xlane.f32.xlu0 %v372_v34  ;;  %vm667_vm11 = vcmp.gt.f32.partialorder %v665_v32, 0.0  ;;  %vm666_vm12 = vcmp.gt.f32.partialorder %v664_v28, 0.0  ;;  %v1564_v44 = vpop.eup %1563 }
 0x342   : > { %v1566_v47 = vpop.eup %1565  ;;  %v828_v49 = vsel %vm371_vm6, %v1842_v43, 0.0  ;;  %v525_v51 = vsel %vm371_vm6, %v1564_v44, 0.0 }
 0x343   : > { %v671_v37 = vsel %vm667_vm11, %v665_v32, %v669_v36  ;;  %v670_v38 = vsel %vm666_vm12, %v664_v28, %v668_v35  ;;  %v528_v50 = vsel %vm371_vm6, %v1566_v47, 0.0 }
 0x344   : > { %v673_v40 = vadd.f32 %v671_v37, %v1810_v45  ;;  %v672_v41 = vadd.f32 %v670_v38, %v1815_v46 }
 0x346   : > { %v677_v30 = vsel %vm371_vm6, %v673_v40, -inf  ;;  %v674_v42 = vsel %vm371_vm6, %v672_v41, -inf }
 0x347   : > { %678 = vmax.xlane.f32.xlu1 %v677_v30  ;;  %675 = vmax.xlane.f32.xlu0 %v674_v42 }
 0x34b   : > { %832 = vadd.xlane.f32.xlu1 %v831_v48  ;;  %829 = vadd.xlane.f32.xlu0 %v828_v49 }
 0x34f   : > { %529 = vadd.xlane.f32.xlu1 %v528_v50  ;;  %526 = vadd.xlane.f32.xlu0 %v525_v51 }
 0x360   : > { %840 = vrot.lane.b32.xlu1 %v1850_v52, %s1701_s20 }
 0x365   : > { %537 = vrot.lane.b32.xlu0 %v1792_v12, %s1701_s20 }
 0x3ce   : > { %v377_v53 = vpop.xlane.xlu1 %376  ;;  %v374_v54 = vpop.xlane.xlu0 %373 }
 0x3cf   : > { %v379_v55 = vsub.f32 %v370_v29, %v377_v53  ;;  %v378_v56 = vsub.f32 %v369_v31, %v374_v54 }
 0x3d1   : > { %v382_v57 = vmul.f32 1.442695, %v379_v55  ;;  %v380_v58 = vmul.f32 1.442695, %v378_v56 }
 0x3d3   : > { %1567 = vpow2.f32 %v382_v57 }
 0x3d4   : > { %1569 = vpow2.f32 %v380_v58  ;;  %v679_v59 = vpop.xlane.xlu1 %678  ;;  %v676_v60 = vpop.xlane.xlu0 %675 }
 0x3d5   : > { %v681_v61 = vsub.f32 %v673_v40, %v679_v59  ;;  %v680_v62 = vsub.f32 %v672_v41, %v676_v60 }
 0x3d7   : > { %v684_v12 = vmul.f32 1.442695, %v681_v61  ;;  %v682_v63 = vmul.f32 1.442695, %v680_v62 }
 0x3d8   : > { %v833_v0 = vpop.xlane.xlu1 %832  ;;  %v830_v1 = vpop.xlane.xlu0 %829 }
 0x3d9   : > { %1571 = vpow2.f32 %v684_v12 }
 0x3da   : > { %1573 = vpow2.f32 %v682_v63 }
 0x3dc   : > { %v530_v2 = vpop.xlane.xlu1 %529  ;;  %v527_v3 = vpop.xlane.xlu0 %526 }
 0x3dd   : > { %v1568_v5 = vpop.eup %1567  ;;  %1575 = vrcp.f32 %v530_v2 }
 0x3de   : > { %v1570_v6 = vpop.eup %1569  ;;  %1577 = vrcp.f32 %v527_v3  ;;  %v387_v7 = vsel %vm371_vm6, %v1568_v5, 0.0 }
 0x3df   : > { %v384_v8 = vsel %vm371_vm6, %v1570_v6, 0.0  ;;  %388 = vadd.xlane.f32.xlu0 %v387_v7  ;;  %1579 = vrcp.f32 %v833_v0  ;;  %v1557_v7 = vld [vmem:[%s1977_s3] sm:$0xff]  }
 0x3e0   : > { %385 = vadd.xlane.f32.xlu1 %v384_v8  ;;  %v538_v9 = vpop.permute.xlu0 %537  ;;  %1581 = vrcp.f32 %v830_v1  ;;  %v841_v18 = vpop.permute.xlu1 %840  ;;  %v1558_v8 = vld [vmem:[%s1977_s3 + $0x8] sm:$0xff]  }
 0x3e1   : > { %1460 = vmatpush3.bf16.msra.mxu0 %v538_v9 }
 0x3e2   : > { %1471 = vmatprep.subr.bf16.mxu0 %v1695_v4 }
 0x3e3   : > { %v1572_v10 = vpop.eup %1571 }
 0x3e4   : > { %v1574_v11 = vpop.eup %1573  ;;  %v689_v13 = vsel %vm371_vm6, %v1572_v10, 0.0 }
 0x3e5   : > { %690 = vadd.xlane.f32.xlu1 %v689_v13  ;;  %v686_v14 = vsel %vm371_vm6, %v1574_v11, 0.0 }
 0x3e6   : > { %687 = vadd.xlane.f32.xlu0 %v686_v14 }
 0x3e7   : > { %v1576_v15 = vpop.eup %1575 }
 0x3e8   : > { %v1578_v16 = vpop.eup %1577  ;;  %v534_v17 = vmul.f32 %v1576_v15, %v1566_v47 }
 0x3e9   : > { %v533_v19 = vmul.f32 %v1578_v16, %v1564_v44  ;;  %v1580_v20 = vpop.eup %1579 }
 0x3ea   : > { %v1582_v22 = vpop.eup %1581  ;;  %v837_v23 = vmul.f32 %v1580_v20, %v1838_v26 }
 0x3eb   : > { %v535_v21 = vpack.c.bf16 %v534_v17, %v533_v19  ;;  %v836_v24 = vmul.f32 %v1582_v22, %v1842_v43 }
 0x3ed   : > { %1462 = vmatmul.mubr.msk.bf16.vlgmr.msra.gmra.mrb[4].mxu0 %vm371_vm6, %v535_v21  ;;  %v838_v25 = vpack.c.bf16 %v837_v23, %v836_v24 }
 0x3ee   : > { %1472 = vmatpush3.bf16.msra.mxu0 %v841_v18  ;;  %1473 = vmatprep.mubr.msk.bf16.mxu0 %vm1702_vm13, %v1695_v4 }
 0x3ef   : > { %1485 = vmatprep.subr.bf16.mxu0 %v1695_v4 }
 0x3f5   : > { %1474 = vmatmul.mubr.msk.bf16.vlgmr.msra.gmra.mrb[8].mxu0 %vm371_vm6, %v838_v25 }
 0x3f6   : > { %1487 = vmatprep.mubr.msk.bf16.mxu0 %vm1702_vm13, %v1695_v4 }
 0x46c   : > { %v389_v27 = vpop.xlane.xlu0 %388 }
 0x46d   : > { %v386_v29 = vpop.xlane.xlu1 %385  ;;  %1583 = vrcp.f32 %v389_v27 }
 0x46e   : > { %1585 = vrcp.f32 %v386_v29 }
 0x472   : > { %v691_v31 = vpop.xlane.xlu1 %690 }
 0x473   : > { %1587 = vrcp.f32 %v691_v31  ;;  %v688_v28 = vpop.xlane.xlu0 %687 }
 0x474   : > { %1589 = vrcp.f32 %v688_v28 }
 0x477   : > { %v1584_v32 = vpop.eup %1583 }
 0x478   : > { %v1586_v33 = vpop.eup %1585  ;;  %v393_v34 = vmul.f32 %v1584_v32, %v1568_v5 }
 0x479   : > { %v392_v35 = vmul.f32 %v1586_v33, %v1570_v6 }
 0x47b   : > { %v394_v36 = vpack.c.bf16 %v393_v34, %v392_v35 }
 0x47d   : > { %v1588_v37 = vpop.eup %1587  ;;  %1456 = vmatmul.mubr.msk.bf16.vlgmr.msra.gmra.mrb[0].mxu1 %vm371_vm6, %v394_v36 }
 0x47e   : > { %v1590_v38 = vpop.eup %1589  ;;  %1466 = vmatpush3.bf16.msra.mxu1 %v1850_v52  ;;  %1467 = vmatprep.mubr.msk.bf16.mxu1 %vm1702_vm13, %v1695_v4  ;;  %v695_v40 = vmul.f32 %v1588_v37, %v1572_v10 }
 0x47f   : > { %v694_v41 = vmul.f32 %v1590_v38, %v1574_v11  ;;  %1477 = vmatprep.subr.bf16.mxu1 %v1557_v7 }
 0x481   : > { %v696_v26 = vpack.c.bf16 %v695_v40, %v694_v41 }
 0x485   : > { %1468 = vmatmul.mubr.msk.bf16.vlgmr.msra.gmra.mrb[4].mxu1 %vm371_vm6, %v696_v26 }
 0x486   : > { %1478 = vmatpush3.bf16.msra.mxu1 %v1557_v7 }
 0x487   : > { %1479 = vmatprep.subr.bf16.mxu1 %v1558_v8 }
 0x48a   : > { %1480 = vmatpush3.bf16.msra.mxu1 %v1558_v8 }
 0x48b   : > { %1491 = vmatprep.subr.bf16.mxu1 %v1695_v4 }
 0x4c0   : > { %v577_v30 = vpop.f32.mrb[4].mxu0 }
 0x4c1   : > { %v586_v42 = vmin.f32 %v577_v30, 0.0  ;;  %v1463_v43 = vpop.f32.mrb[5].mxu0  ;;  %vm584_vm14 = vcmp.gt.f32.partialorder %v577_v30, 0.0 }
 0x4c2   : > { %v580_v44 = vpop.f32.mrb[6].mxu0 }
 0x4c3   : > { %v588_v47 = vmul.f32 1.442695, %v586_v42  ;;  %v587_v48 = vmin.f32 %v580_v44, 0.0  ;;  %v1464_v49 = vpop.f32.mrb[7].mxu0  ;;  %vm585_vm15 = vcmp.gt.f32.partialorder %v580_v44, 0.0 }
 0x4c5   : > { %1591 = vpow2.f32 %v588_v47  ;;  %v590_v50 = vmul.f32 1.442695, %v587_v48 }
 0x4c7   : > { %1593 = vpow2.f32 %v590_v50 }
 0x4c8   : > { %v880_v51 = vpop.f32.mrb[8].mxu0 }
 0x4c9   : > { %v889_v52 = vmin.f32 %v880_v51, 0.0  ;;  %v1475_v53 = vpop.f32.mrb[9].mxu0  ;;  %vm887_vm0 = vcmp.gt.f32.partialorder %v880_v51, 0.0 }
 0x4ca   : > { %v883_v54 = vpop.f32.mrb[10].mxu0 }
 0x4cb   : > { %v891_v55 = vmul.f32 1.442695, %v889_v52  ;;  %v890_v56 = vmin.f32 %v883_v54, 0.0  ;;  %v1476_v57 = vpop.f32.mrb[11].mxu0  ;;  %vm888_vm1 = vcmp.gt.f32.partialorder %v883_v54, 0.0 }
 0x4cd   : > { %1595 = vpow2.f32 %v891_v55  ;;  %v893_v58 = vmul.f32 1.442695, %v890_v56 }
 0x4cf   : > { %v1592_v59 = vpop.eup %1591  ;;  %1597 = vpow2.f32 %v893_v58 }
 0x4d0   : > { %v1399_v60 = vadd.f32 -1.0, %v1592_v59 }
 0x4d1   : > { %v1594_v61 = vpop.eup %1593 }
 0x4d2   : > { %v594_v62 = vsel %vm584_vm14, %v577_v30, %v1399_v60  ;;  %v1400_v12 = vadd.f32 -1.0, %v1594_v61 }
 0x4d3   : > { %598 = vrot.lane.b32.xlu0 %v594_v62, %s1703_s22 }
 0x4d4   : > { %v595_v63 = vsel %vm585_vm15, %v580_v44, %v1400_v12 }
 0x4d5   : > { %600 = vrot.lane.b32.xlu1 %v595_v63, %s1703_s22 }
 0x4d7   : > { %v1596_v0 = vpop.eup %1595 }
 0x4d8   : > { %v1405_v1 = vadd.f32 -1.0, %v1596_v0 }
 0x4d9   : > { %v1598_v2 = vpop.eup %1597 }
 0x4da   : > { %v897_v3 = vsel %vm887_vm0, %v880_v51, %v1405_v1  ;;  %v1406_v5 = vadd.f32 -1.0, %v1598_v2 }
 0x4db   : > { %901 = vrot.lane.b32.xlu1 %v897_v3, %s1703_s22 }
 0x4dc   : > { %v898_v6 = vsel %vm888_vm1, %v883_v54, %v1406_v5 }
 0x4dd   : > { %903 = vrot.lane.b32.xlu0 %v898_v6, %s1703_s22 }
 0x545   : > { %v599_v33 = vpop.permute.xlu0 %598 }
 0x547   : > { %v601_v35 = vpop.permute.xlu1 %600 }
 0x54d   : > { %v902_v26 = vpop.permute.xlu1 %901 }
 0x54f   : > { %v904_v42 = vpop.permute.xlu0 %903 }
 0x550   : > { %v432_v9 = vpop.f32.mrb[0].mxu1 }
 0x551   : > { %v441_v10 = vmin.f32 %v432_v9, 0.0  ;;  %v1457_v11 = vpop.f32.mrb[1].mxu1  ;;  %vm439_vm3 = vcmp.gt.f32.partialorder %v432_v9, 0.0 }
 0x552   : > { %v435_v13 = vpop.f32.mrb[2].mxu1 }
 0x553   : > { %v443_v14 = vmul.f32 1.442695, %v441_v10  ;;  %v442_v15 = vmin.f32 %v435_v13, 0.0  ;;  %v1458_v16 = vpop.f32.mrb[3].mxu1  ;;  %vm440_vm5 = vcmp.gt.f32.partialorder %v435_v13, 0.0 }
 0x555   : > { %1599 = vpow2.f32 %v443_v14  ;;  %v445_v17 = vmul.f32 1.442695, %v442_v15 }
 0x557   : > { %1601 = vpow2.f32 %v445_v17 }
 0x558   : > { %v734_v19 = vpop.f32.mrb[4].mxu1 }
 0x559   : > { %v743_v20 = vmin.f32 %v734_v19, 0.0  ;;  %v1469_v21 = vpop.f32.mrb[5].mxu1  ;;  %vm741_vm7 = vcmp.gt.f32.partialorder %v734_v19, 0.0 }
 0x55a   : > { %v737_v22 = vpop.f32.mrb[6].mxu1 }
 0x55b   : > { %v745_v18 = vmul.f32 1.442695, %v743_v20  ;;  %v744_v23 = vmin.f32 %v737_v22, 0.0  ;;  %v1470_v24 = vpop.f32.mrb[7].mxu1  ;;  %vm742_vm8 = vcmp.gt.f32.partialorder %v737_v22, 0.0 }
 0x55d   : > { %1603 = vpow2.f32 %v745_v18  ;;  %v747_v25 = vmul.f32 1.442695, %v744_v23 }
 0x55f   : > { %v1600_v27 = vpop.eup %1599  ;;  %1605 = vpow2.f32 %v747_v25 }
 0x560   : > { %v1396_v29 = vadd.f32 -1.0, %v1600_v27 }
 0x561   : > { %v1602_v31 = vpop.eup %1601 }
 0x562   : > { %v449_v28 = vsel %vm439_vm3, %v432_v9, %v1396_v29  ;;  %v1397_v32 = vadd.f32 -1.0, %v1602_v31 }
 0x563   : > { %451 = vst.msk [vmem:[#allocation4] sm:$0xff] %vm371_vm6, %v449_v28 }
 0x564   : > { %605 = vst.msk [vmem:[#allocation4] sm:$0xff] %vm604_vm4, %v599_v33  ;;  %v450_v34 = vsel %vm440_vm5, %v435_v13, %v1397_v32 }
 0x565   : > { %452 = vst.msk [vmem:[#allocation4 + $0x8] sm:$0xff] %vm371_vm6, %v450_v34 }
 0x566   : > { %606 = vst.msk [vmem:[#allocation4 + $0x8] sm:$0xff] %vm604_vm4, %v601_v35 }
 0x567   : > { %v1604_v36 = vpop.eup %1603 }
 0x568   : > { %v1402_v37 = vadd.f32 -1.0, %v1604_v36 }
 0x569   : > { %v1606_v38 = vpop.eup %1605 }
 0x56a   : > { %v751_v40 = vsel %vm741_vm7, %v734_v19, %v1402_v37  ;;  %v1403_v41 = vadd.f32 -1.0, %v1606_v38 }
 0x56b   : > { %754 = vst.msk [vmem:[#allocation4 + $0x10] sm:$0xff] %vm371_vm6, %v751_v40  ;;  %v909_v43 = vld [vmem:[#allocation4] sm:$0xff] }
 0x56c   : > { %907 = vst.msk [vmem:[#allocation4 + $0x10] sm:$0xff] %vm604_vm4, %v902_v26  ;;  %v752_v30 = vsel %vm742_vm8, %v737_v22, %v1403_v41 }
 0x56d   : > { %755 = vst.msk [vmem:[#allocation4 + $0x18] sm:$0xff] %vm371_vm6, %v752_v30  ;;  %v910_v44 = vld [vmem:[#allocation4 + $0x8] sm:$0xff] }
 0x56e   : > { %908 = vst.msk [vmem:[#allocation4 + $0x18] sm:$0xff] %vm604_vm4, %v904_v42  ;;  %v913_v47 = vpack.c.bf16 %v910_v44, %v909_v43 }
 0x570   : > { %1481 = vmatprep.mubr.msk.bf16.mxu1 %vm282_vm2, %v913_v47 }
 0x573   : > { %v911_v48 = vld [vmem:[#allocation4 + $0x10] sm:$0xff] }
 0x575   : > { %v912_v49 = vld [vmem:[#allocation4 + $0x18] sm:$0xff] }
 0x576   : > { %v914_v50 = vpack.c.bf16 %v912_v49, %v911_v48 }
 0x578   : > { %1482 = vmatmul.mubr.msk.bf16.vlgmr.msra.gmra.mrb[8].mxu1 %vm282_vm2, %v914_v50  ;;  %vm1006_vm2 = vcmask 15360  }
 0x579   : > { %1493 = vmatprep.mubr.msk.bf16.mxu1 %vm1702_vm13, %v1695_v4 }
 0x64b   : > { %v1483_v51 = vpop.f32.mrb[8].mxu1 }
 0x64c   : > { %998 = vrot.lane.b32.xlu0 %v1483_v51, %s1701_s20  ;;  %v971_v52 = vpop.f32.mrb[9].mxu1 }
 0x64d   : > { %994 = vrot.lane.b32.xlu1 %v971_v52, %s1701_s20  ;;  %v1484_v53 = vpop.f32.mrb[10].mxu1 }
 0x64e   : > { %v987_v54 = vpack.c.bf16 %v1484_v53, %v1483_v51  ;;  %v974_v55 = vpop.f32.mrb[11].mxu1 }
 0x64f   : > { %v986_v56 = vpack.c.bf16 %v974_v55, %v971_v52 }
 0x650   : > { %989 = vst.msk [vmem:[#allocation5 + $0x8] sm:$0xff] %vm371_vm6, %v987_v54  ;;  %1000 = vrot.lane.b32.xlu0 %v1484_v53, %s1701_s20 }
 0x651   : > { %988 = vst.msk [vmem:[#allocation5] sm:$0xff] %vm371_vm6, %v986_v56  ;;  %996 = vrot.lane.b32.xlu1 %v974_v55, %s1701_s20  ;;  %s1635_s20 = sshll.u32 %s1705_s14, 4  ;;  %s1636_s20 = int_to_ptr.vmem [resolvable:$false] %s1635_s20 }
 0x652   : > { %s1637_s22 = scalar_lea.vmem %s1636_s20, 1024  ;;  %p1638_p0 = scmp.lt.s32.totalorder %s1924_s8, %s1636_s20 }
 0x653   : > { %p1639_p1 = scmp.lt.s32.totalorder %s1637_s22, %s1631_s13 }
 0x655   : > { %p1640_p2 = por %p1639_p1, %p1638_p0 }
 0x657   : > { %v1158_v57 = vld [vmem:[#allocation5 + $0x8] sm:$0xff]  ;;  %p1641_p3 = pnand %p1640_p2, %p1634_p13 }
 0x658   : > { %1492 = vmatpush3.bf16.msra.mxu1 %v1158_v57  ;;  %v1011_v4 = vld [vmem:[#allocation5] sm:$0xff] }
 0x659   : > { %1486 = vmatpush3.bf16.msra.mxu0 %v1011_v4 }
 0x6be   : > { %v999_v58 = vpop.permute.xlu0 %998 }
 0x6bf   : > { %1009 = vst.msk [vmem:[#allocation6 + $0x10] sm:$0xff] %vm1006_vm2, %v999_v58  ;;  %v995_v59 = vpop.permute.xlu1 %994 }
 0x6c0   : > { %1007 = vst.msk [vmem:[#allocation6] sm:$0xff] %vm1006_vm2, %v995_v59 }
 0x6c2   : > { %v1001_v60 = vpop.permute.xlu0 %1000 }
 0x6c3   : > { %1010 = vst.msk [vmem:[#allocation6 + $0x18] sm:$0xff] %vm1006_vm2, %v1001_v60  ;;  %v997_v61 = vpop.permute.xlu1 %996 }
 0x6c4   : > { %1008 = vst.msk [vmem:[#allocation6 + $0x8] sm:$0xff] %vm1006_vm2, %v997_v61 }
 0x6c6   : > { %v1160_v62 = vld [vmem:[#allocation6 + $0x10] sm:$0xff] }
 0x6c7   : > { %1164 = vrot.lane.b32.xlu0 %v1160_v62, %s1704_s30  ;;  %v1012_v12 = vld [vmem:[#allocation6] sm:$0xff] }
 0x6c8   : > { %1016 = vrot.lane.b32.xlu1 %v1012_v12, %s1704_s30 }
 0x6ca   : > { %v1161_v63 = vld [vmem:[#allocation6 + $0x18] sm:$0xff] }
 0x6cb   : > { %1166 = vrot.lane.b32.xlu0 %v1161_v63, %s1704_s30  ;;  %v1013_v0 = vld [vmem:[#allocation6 + $0x8] sm:$0xff] }
 0x6cc   : > { %1018 = vrot.lane.b32.xlu1 %v1013_v0, %s1704_s30 }
 0x6cf   : > { %1207 = vperm.xlu0 %1553, %v1161_v63  }
 0x6d0   : > { %1055 = vperm.xlu1 %1554, %v1012_v12  }
 0x6d3   : > { %1059 = vperm.xlu0 %1553, %v1013_v0  }
 0x6d4   : > { %1203 = vperm.xlu1 %1554, %v1160_v62  }
 0x739   : > { %v1165_v1 = vpop.permute.xlu0 %1164 }
 0x73a   : > { %1170 = vxpose.xlu0.b32.start [1/2] (short) (narrow) %v1165_v1, 8  ;;  %v1017_v2 = vpop.permute.xlu1 %1016 }
 0x73b   : > { %1022 = vxpose.xlu1.b32.start [1/2] (short) (narrow) %v1017_v2, 8 }
 0x73d   : > { %v1167_v3 = vpop.permute.xlu0 %1166 }
 0x73e   : > { %1171 = vxpose.xlu0.b32.end [2/2] (short) (narrow) %v1167_v3, 8  ;;  %v1019_v5 = vpop.permute.xlu1 %1018 }
 0x73f   : > { %1023 = vxpose.xlu1.b32.end [2/2] (short) (narrow) %v1019_v5, 8 }
 0x74e   : > { %v1208_v6 = vpop.permute.xlu0 %1207 }
 0x74f   : > { %v1056_v7 = vpop.permute.xlu1 %1055 }
 0x752   : > { %v1060_v8 = vpop.permute.xlu0 %1059 }
 0x753   : > { %v1204_v9 = vpop.permute.xlu1 %1203 }
 0x7ba   : > { %v1186_v10 = vpop.trf.xlu0 }
 0x7bb   : > { %v1213_v11 = vrot.slane %v1186_v10, %v1804_v39  ;;  %v1038_v13 = vpop.trf.xlu1 }
 0x7bc   : > { %v1065_v14 = vrot.slane %v1038_v13, %v1804_v39 }
 0x7bd   : > { %v1214_v15 = vadd.f32 %v1213_v11, %v1204_v9  ;;  %v1215_v16 = vadd.f32 %v1213_v11, %v1208_v6 }
 0x7be   : > { %v1066_v17 = vadd.f32 %v1065_v14, %v1056_v7  ;;  %v1067_v19 = vadd.f32 %v1065_v14, %v1060_v8 }
 0x7bf   : > { %v1218_v20 = vmul.f32 0.2, %v1214_v15  ;;  %v1219_v21 = vmul.f32 0.2, %v1215_v16  ;;  %vm1217_vm9 = vcmp.gt.f32.partialorder %v1215_v16, 0.0  ;;  %vm1216_vm10 = vcmp.gt.f32.partialorder %v1214_v15, 0.0 }
 0x7c0   : > { %v1070_v22 = vmul.f32 0.2, %v1066_v17  ;;  %v1071_v18 = vmul.f32 0.2, %v1067_v19  ;;  %vm1069_vm11 = vcmp.gt.f32.partialorder %v1067_v19, 0.0  ;;  %vm1068_vm12 = vcmp.gt.f32.partialorder %v1066_v17, 0.0 }
 0x7c1   : > { %v1221_v25 = vsel %vm1217_vm9, %v1215_v16, %v1219_v21  ;;  %v1220_v27 = vsel %vm1216_vm10, %v1214_v15, %v1218_v20 }
 0x7c2   : > { %v1073_v23 = vsel %vm1069_vm11, %v1067_v19, %v1071_v18  ;;  %v1072_v24 = vsel %vm1068_vm12, %v1066_v17, %v1070_v22  ;;  %v1223_v32 = vadd.f32 %v1221_v25, %v1810_v45  ;;  %v1222_v33 = vadd.f32 %v1220_v27, %v1815_v46 }
 0x7c3   : > { %v1075_v29 = vadd.f32 %v1073_v23, %v1810_v45  ;;  %v1074_v39 = vadd.f32 %v1072_v24, %v1815_v46 }
 0x7c4   : > { %v1227_v34 = vsel %vm371_vm6, %v1223_v32, -inf  ;;  %v1224_v35 = vsel %vm371_vm6, %v1222_v33, -inf }
 0x7c5   : > { %v1079_v31 = vsel %vm371_vm6, %v1075_v29, -inf  ;;  %v1076_v28 = vsel %vm371_vm6, %v1074_v39, -inf }
 0x7c6   : > { %1080 = vmax.xlane.f32.xlu1 %v1079_v31  ;;  %1077 = vmax.xlane.f32.xlu0 %v1076_v28 }
 0x7ca   : > { %1228 = vmax.xlane.f32.xlu1 %v1227_v34  ;;  %1225 = vmax.xlane.f32.xlu0 %v1224_v35 }
 0x853   : > { %v1081_v36 = vpop.xlane.xlu1 %1080  ;;  %v1078_v37 = vpop.xlane.xlu0 %1077 }
 0x854   : > { %v1083_v38 = vsub.f32 %v1075_v29, %v1081_v36  ;;  %v1082_v40 = vsub.f32 %v1074_v39, %v1078_v37 }
 0x856   : > { %v1086_v41 = vmul.f32 1.442695, %v1083_v38  ;;  %v1084_v26 = vmul.f32 1.442695, %v1082_v40 }
 0x857   : > { %v1229_v30 = vpop.xlane.xlu1 %1228  ;;  %v1226_v42 = vpop.xlane.xlu0 %1225 }
 0x858   : > { %1607 = vpow2.f32 %v1086_v41  ;;  %v1231_v45 = vsub.f32 %v1223_v32, %v1229_v30  ;;  %v1230_v43 = vsub.f32 %v1222_v33, %v1226_v42 }
 0x859   : > { %1609 = vpow2.f32 %v1084_v26 }
 0x85a   : > { %v1234_v46 = vmul.f32 1.442695, %v1231_v45  ;;  %v1232_v44 = vmul.f32 1.442695, %v1230_v43 }
 0x85c   : > { %1611 = vpow2.f32 %v1234_v46 }
 0x85d   : > { %1613 = vpow2.f32 %v1232_v44 }
 0x862   : > { %v1608_v47 = vpop.eup %1607 }
 0x863   : > { %v1610_v48 = vpop.eup %1609  ;;  %v1091_v49 = vsel %vm371_vm6, %v1608_v47, 0.0 }
 0x864   : > { %1092 = vadd.xlane.f32.xlu1 %v1091_v49  ;;  %v1088_v50 = vsel %vm371_vm6, %v1610_v48, 0.0 }
 0x865   : > { %1089 = vadd.xlane.f32.xlu0 %v1088_v50 }
 0x866   : > { %v1612_v51 = vpop.eup %1611 }
 0x867   : > { %v1614_v52 = vpop.eup %1613  ;;  %v1239_v53 = vsel %vm371_vm6, %v1612_v51, 0.0 }
 0x868   : > { %1240 = vadd.xlane.f32.xlu1 %v1239_v53  ;;  %v1236_v54 = vsel %vm371_vm6, %v1614_v52, 0.0 }
 0x869   : > { %1237 = vadd.xlane.f32.xlu0 %v1236_v54 }
 0x8f1   : > { %v1093_v55 = vpop.xlane.xlu1 %1092 }
 0x8f2   : > { %1615 = vrcp.f32 %v1093_v55  ;;  %v1090_v56 = vpop.xlane.xlu0 %1089 }
 0x8f3   : > { %1617 = vrcp.f32 %v1090_v56 }
 0x8f5   : > { %v1241_v57 = vpop.xlane.xlu1 %1240 }
 0x8f6   : > { %1619 = vrcp.f32 %v1241_v57  ;;  %v1238_v4 = vpop.xlane.xlu0 %1237 }
 0x8f7   : > { %1621 = vrcp.f32 %v1238_v4 }
 0x8fc   : > { %v1616_v58 = vpop.eup %1615 }
 0x8fd   : > { %v1618_v59 = vpop.eup %1617  ;;  %v1097_v60 = vmul.f32 %v1616_v58, %v1608_v47 }
 0x8fe   : > { %v1096_v61 = vmul.f32 %v1618_v59, %v1610_v48 }
 0x900   : > { %v1620_v62 = vpop.eup %1619  ;;  %v1098_v12 = vpack.c.bf16 %v1097_v60, %v1096_v61 }
 0x901   : > { %v1622_v63 = vpop.eup %1621  ;;  %v1245_v0 = vmul.f32 %v1620_v62, %v1612_v51 }
 0x902   : > { %v1244_v1 = vmul.f32 %v1622_v63, %v1614_v52  ;;  %1488 = vmatmul.mubr.msk.bf16.vlgmr.msra.gmra.mrb[12].mxu0 %vm371_vm6, %v1098_v12 }
 0x904   : > { %v1246_v2 = vpack.c.bf16 %v1245_v0, %v1244_v1 }
 0x906   : > { %1494 = vmatmul.mubr.msk.bf16.vlgmr.msra.gmra.mrb[12].mxu1 %vm371_vm6, %v1246_v2 }
 0x9d5   : > { %v1136_v3 = vpop.f32.mrb[12].mxu0 }
 0x9d6   : > { %v1145_v5 = vmin.f32 %v1136_v3, 0.0  ;;  %v1489_v6 = vpop.f32.mrb[13].mxu0  ;;  %vm1143_vm13 = vcmp.gt.f32.partialorder %v1136_v3, 0.0 }
 0x9d7   : > { %v1139_v7 = vpop.f32.mrb[14].mxu0 }
 0x9d8   : > { %v1147_v8 = vmul.f32 1.442695, %v1145_v5  ;;  %v1146_v9 = vmin.f32 %v1139_v7, 0.0  ;;  %v1490_v10 = vpop.f32.mrb[15].mxu0  ;;  %vm1144_vm14 = vcmp.gt.f32.partialorder %v1139_v7, 0.0 }
 0x9d9   : > { %v1284_v11 = vpop.f32.mrb[12].mxu1 }
 0x9da   : > { %1623 = vpow2.f32 %v1147_v8  ;;  %v1149_v13 = vmul.f32 1.442695, %v1146_v9  ;;  %v1293_v14 = vmin.f32 %v1284_v11, 0.0  ;;  %v1495_v15 = vpop.f32.mrb[13].mxu1  ;;  %vm1291_vm15 = vcmp.gt.f32.partialorder %v1284_v11, 0.0 }
 0x9db   : > { %v1287_v16 = vpop.f32.mrb[14].mxu1 }
 0x9dc   : > { %1625 = vpow2.f32 %v1149_v13  ;;  %v1295_v17 = vmul.f32 1.442695, %v1293_v14  ;;  %v1294_v19 = vmin.f32 %v1287_v16, 0.0  ;;  %v1496_v20 = vpop.f32.mrb[15].mxu1  ;;  %vm1292_vm0 = vcmp.gt.f32.partialorder %v1287_v16, 0.0 }
 0x9de   : > { %1627 = vpow2.f32 %v1295_v17  ;;  %v1297_v21 = vmul.f32 1.442695, %v1294_v19 }
 0x9e0   : > { %1629 = vpow2.f32 %v1297_v21 }
 0x9e4   : > { %v1624_v22 = vpop.eup %1623 }
 0x9e5   : > { %v1412_v18 = vadd.f32 -1.0, %v1624_v22 }
 0x9e6   : > { %v1626_v23 = vpop.eup %1625 }
 0x9e7   : > { %v1153_v24 = vsel %vm1143_vm13, %v1136_v3, %v1412_v18  ;;  %v1413_v25 = vadd.f32 -1.0, %v1626_v23 }
 0x9e8   : > { %v1628_v27 = vpop.eup %1627  ;;  %1155 = vst.msk [vmem:[%s193_s7] sm:$0xff] %vm371_vm6, %v1153_v24 }
 0x9e9   : > { %v1154_v29 = vsel %vm1144_vm14, %v1139_v7, %v1413_v25  ;;  %v1415_v39 = vadd.f32 -1.0, %v1628_v27 }
 0x9ea   : > { %v1630_v31 = vpop.eup %1629  ;;  %1156 = vst.msk [vmem:[%s193_s7 + $0x8] sm:$0xff] %vm371_vm6, %v1154_v29 }
 0x9eb   : > { %v1301_v28 = vsel %vm1291_vm15, %v1284_v11, %v1415_v39  ;;  %v1416_v32 = vadd.f32 -1.0, %v1630_v31 }
 0x9ec   : > { %1417 = vst.msk [vmem:[%s193_s7 + $0x10] sm:$0xff] %vm371_vm6, %v1301_v28 }
 0x9ed   : > { %v1302_v33 = vsel %vm1292_vm0, %v1287_v16, %v1416_v32 }
 0x9ee   : > { %1418 = vst.msk [vmem:[%s193_s7 + $0x18] sm:$0xff] %vm371_vm6, %v1302_v33 }
 0x9ef   : > { %1644 = shalt.err (!%p1641_p3)
}
 0x9f0   : > { %s1645_s23 = scalar_lea.hbm %s1930_s12, 512  ;;  %s1649_s29 = scalar_lea.hbm %s1978_s4, 1024 }
 0x9f1   : > { %p1646_p4 = scmp.ne.s32.totalorder %s1930_s12, %s1645_s23  ;;  %p1650_p9 = scmp.lt.u32.totalorder %s1930_s12, %s1978_s4 }
 0x9f2   : > { %p1651_p10 = scmp.lt.u32.totalorder %s1649_s29, %s1645_s23  ;;  %p1653_p12 = scmp.lt.u32.totalorder %s1645_s23, %s1930_s12 }
 0x9f3   : > { %p1647_p7 = pnand %p1646_p4, %p1771_p5 }
 0x9f4   : > { %p1652_p11 = por %p1651_p10, %p1650_p9 }
 0x9f5   : > { %p1648_p8 = pneg %p1647_p7 }
 0x9f6   : > { %p1654_p13 = por %p1653_p12, %p1652_p11 }
 0x9f8   : > { %p1655_p0 = pnand %p1654_p13, %p1648_p8 }
 0x9fa   : > { %1658 = shalt.err (!%p1655_p0)
}
 0x9fb   : > { %s1706_s6 = smov 128   ;;  %s1707_s7 = smov 8  }
 0x9fc   : > { %1498 = dma.vmem_to_hbm [thread:$0]  (%p1771_p5), %s1924_s8, 512, %s1930_s12, %s1933_s19, %s1706_s6, %s1706_s6, %s1707_s7  }
 0x9fd PF: > { %p1504_p1 = scmp.ge.s32.totalorder %s1693_s18, 2  ;;  %s1336_s9 = sand.u32 1, %s1681_s15  }
 0x9fe   : > { %s1337_s10 = scalar_lea.sflag [#allocation8], %s1336_s9 }
 0x9ff   : > { %p1501_p2 = pnand %p1504_p1, %p1775_p6 }
 0xa01   : > { %1676 = dma.done.wait (!%p1501_p2), %s1337_s10, 512  }
 0xa02   : > { %1678 = vsyncadd (!%p1501_p2), %s1337_s10, 4294966784  ;;  %p14_p3 = scmp.ge.s32.totalorder %s1758_s21, 4   ;;  %s1981_s15 = smov %s1685_s16 }
 0xa03   : > { %s1982_s16 = smov %s1689_s17  ;;  %s1983_s17 = smov %s1769_s24 }
 0xa04   : > { %s1984_s18 = smov %s1758_s21  ;;  %16 = sbr.rel (!%p14_p3) target bundleno = 3 (0x3), region = 77 }
 0xa0b   :  { %1342 = vsyncpa [#allocation8], 1 }
 0xa0c   :  { %1344 = vsyncpa [#allocation8 + $0x1], 1 }

</bundles_post_ra>
